<compile_context>
chip_gen: v6e
topology: v6e:2x2x1
jax: 0.10.0
libtpu: 0.0.40
codegen_flags: <defaults>
</compile_context>

<pallas_src>
import functools

import jax
import jax.numpy as jnp
from jax.experimental import pallas as pl
from jax.experimental.pallas import tpu as pltpu

KL_WEIGHT = 1.0  # stand-in for settings.kl_weight
LANE = 128


def _round_up(n, m):
    return ((n + m - 1) // m) * m


def _pad2(a, rows, cols):
    return jnp.pad(a, ((0, rows - a.shape[0]), (0, cols - a.shape[1])))


# --------------------------------------------------------------------------------------
# Kernel
# --------------------------------------------------------------------------------------
def _mlp_vae_kernel(num_layers, head_pad, *refs):
    # refs: x, (w_i, b_i)*num_layers, w_head, b_head, eps, out, kl_rows
    x_ref = refs[0]
    layer_refs = [(refs[1 + 2 * i], refs[2 + 2 * i]) for i in range(num_layers)]
    i0 = 1 + 2 * num_layers
    w_head, b_head = refs[i0], refs[i0 + 1]
    eps_ref = refs[i0 + 2]
    out_ref, kl_ref = refs[i0 + 3], refs[i0 + 4]

    # Hidden stack: bf16 MXU matmuls with f32 accumulation; bias add / ReLU in f32.
    h = x_ref[...]                                      # bf16 (tb, in_pad)
    for i, (w, b) in enumerate(layer_refs):
        z = jnp.dot(h, w[...], preferred_element_type=jnp.float32) + b[...]
        if i != num_layers - 1:
            z = jnp.maximum(z, 0.0)
        h = z.astype(jnp.bfloat16)                      # MXU-native dtype for next dot

    # Fused mu|logvar head: one MXU pass, split at a 128-lane-aligned boundary.
    y = jnp.dot(h, w_head[...], preferred_element_type=jnp.float32) + b_head[...]
    mu = y[:, :head_pad]
    logvar = y[:, head_pad:]

    # Single transcendental: std = exp(0.5*logvar); exp(logvar) = std*std.
    std = jnp.exp(0.5 * logvar)
    # (out kept f32; a bf16 store would halve writeback bytes if acceptable downstream.)
    out_ref[...] = (mu + eps_ref[...] * std).astype(out_ref.dtype)

    # Per-row KL partial (XLU lane reduce). Padded feature lanes contribute exactly 0
    # (mu = logvar = 0 -> 1 + 0 - 0 - 1 = 0); padded batch rows are sliced off in the
    # wrapper, so no in-kernel row mask is needed and the grid axis carries no state.
    kl_ref[...] = -0.5 * jnp.sum(1.0 + logvar - mu * mu - std * std,
                                 axis=1, keepdims=True)


# --------------------------------------------------------------------------------------
# One-time parameter packing (hoisted out of the per-call path)
# --------------------------------------------------------------------------------------
def pack_params(layer_params, mu_params, var_params):
    """Pad weights to lane-dense (multiples of 128) widths, fuse the mu|var head, and
    cast matmul operands to bf16.  Call once at init; pass the result to every forward."""
    in_pad = _round_up(layer_params[0][0].shape[0], LANE)

    layers_packed = []
    for (w, b) in layer_params:
        w_p = _pad2(w.astype(jnp.float32),
                    _round_up(w.shape[0], LANE), _round_up(w.shape[1], LANE))
        b_p = _pad2(b.astype(jnp.float32), 1, _round_up(b.shape[1], LANE))
        layers_packed.append((w_p.astype(jnp.bfloat16), b_p))

    w_mu, b_mu = mu_params
    w_var, b_var = var_params
    out_dim = w_mu.shape[1]
    head_pad = _round_up(out_dim, LANE)
    d_in = _round_up(w_mu.shape[0], LANE)

    w_head = jnp.zeros((d_in, 2 * head_pad), jnp.float32)
    w_head = w_head.at[: w_mu.shape[0], :out_dim].set(w_mu.astype(jnp.float32))
    w_head = w_head.at[: w_var.shape[0], head_pad:head_pad + out_dim].set(
        w_var.astype(jnp.float32))
    b_head = jnp.zeros((1, 2 * head_pad), jnp.float32)
    b_head = b_head.at[0, :out_dim].set(b_mu[0].astype(jnp.float32))
    b_head = b_head.at[0, head_pad:head_pad + out_dim].set(b_var[0].astype(jnp.float32))

    return {
        "layers": layers_packed,
        "w_head": w_head.astype(jnp.bfloat16),
        "b_head": b_head,
        "in_pad": in_pad,
        "head_pad": head_pad,
        "out_dim": out_dim,
        "num_layers": len(layer_params),
    }


def _vmem_budget(packed, tb, in_pad, head_pad):
    """Explicit scoped-VMEM budget: resident weights + double-buffered streamed tiles
    + activation working set, clamped to [32 MiB, 64 MiB] (fits v5e/v6e/v7x)."""
    wbytes = sum(w.size * w.dtype.itemsize + b.size * b.dtype.itemsize
                 for (w, b) in packed["layers"])
    wbytes += packed["w_head"].size * packed["w_head"].dtype.itemsize
    wbytes += packed["b_head"].size * packed["b_head"].dtype.itemsize
    max_w = max([in_pad, 2 * head_pad] + [w.shape[1] for (w, _) in packed["layers"]])
    stream = 2 * tb * (in_pad * 2 + head_pad * 4 + head_pad * 4 + 4)  # x/eps/out/kl, 2-deep
    work = 8 * tb * max_w * 4                                         # activation temps
    est = 2 * wbytes + stream + work + (2 << 20)
    return int(min(max(est, 32 << 20), 64 << 20))


# --------------------------------------------------------------------------------------
# Forward wrapper
# --------------------------------------------------------------------------------------
def mlp_vae_forward(x, packed, eps, tile_b=512):
    """Whole MLP + fused VAE head in one batch-tiled, batch-parallel Pallas kernel."""
    B = x.shape[0]
    in_pad = packed["in_pad"]
    head_pad = packed["head_pad"]
    out_dim = packed["out_dim"]
    num_layers = packed["num_layers"]

    # Grid-first tiling: minimizes dead padded rows (at most 7) on the last tile.
    b8 = _round_up(B, 8)
    grid = pl.cdiv(b8, tile_b)
    tb = _round_up(pl.cdiv(b8, grid), 8)
    b_pad = grid * tb

    x_p = _pad2(x, b_pad, in_pad).astype(jnp.bfloat16)
    eps_p = _pad2(eps.astype(jnp.float32), b_pad, head_pad)

    const_map = lambda i: (0, 0)
    row_map = lambda i: (i, 0)

    kernel = functools.partial(_mlp_vae_kernel, num_layers, head_pad)
    out_shapes = (
        jax.ShapeDtypeStruct((b_pad, head_pad), jnp.float32),  # padded samples
        jax.ShapeDtypeStruct((b_pad, 1), jnp.float32),         # per-row KL partials
    )
    out_specs = (
        pl.BlockSpec((tb, head_pad), row_map),
        pl.BlockSpec((tb, 1), row_map),
    )
    compiler_params = pltpu.CompilerParams(
        # No carried state -> batch axis is parallel (shards across v7x's 2 TCs).
        dimension_semantics=("parallel",),
        vmem_limit_bytes=_vmem_budget(packed, tb, in_pad, head_pad),
    )

    def run(single_buffer_weights):
        const_kw = dict(pipeline_mode=pl.Buffered(1)) if single_buffer_weights else {}
        args = [x_p]
        in_specs = [pl.BlockSpec((tb, in_pad), row_map)]
        for (w, b) in packed["layers"]:
            args += [w, b]
            in_specs += [pl.BlockSpec(w.shape, const_map, **const_kw),
                         pl.BlockSpec(b.shape, const_map, **const_kw)]
        args += [packed["w_head"], packed["b_head"]]
        in_specs += [pl.BlockSpec(packed["w_head"].shape, const_map, **const_kw),
                     pl.BlockSpec(packed["b_head"].shape, const_map, **const_kw)]
        args += [eps_p]
        in_specs += [pl.BlockSpec((tb, head_pad), row_map)]

        return pl.pallas_call(
            kernel,
            out_shape=out_shapes,
            grid=(grid,),
            in_specs=in_specs,
            out_specs=out_specs,
            compiler_params=compiler_params,
        )(*args)

    try:
        out_p, kl_rows = run(single_buffer_weights=True)
    except Exception:
        # pipeline_mode=pl.Buffered(1) unsupported on this jax build -> default buffering.
        out_p, kl_rows = run(single_buffer_weights=False)

    # Tiny final reduction in the wrapper (padded rows sliced away here).
    div = jnp.mean(kl_rows[:B, 0])
    loss = KL_WEIGHT * div
    return out_p[:B, :out_dim], loss, div


# --------------------------------------------------------------------------------------
# Init + references
# --------------------------------------------------------------------------------------
def init_mlp_params(key, input_dim, output_dim, num_layers, hidden_dim=64):
    """Init mirroring the PyTorch module's layer shapes.
    Weights stored as (in_dim, out_dim) (transposed w.r.t. nn.Linear), biases (1, out_dim)."""
    layer_params = []
    in_dim = input_dim
    out_dim = hidden_dim if num_layers > 1 else output_dim
    for li in range(num_layers):
        key, kw, kb = jax.random.split(key, 3)
        bound = 1.0 / jnp.sqrt(in_dim)
        w = jax.random.uniform(kw, (in_dim, out_dim), jnp.float32, -bound, bound)
        b = jax.random.uniform(kb, (1, out_dim), jnp.float32, -bound, bound)
        layer_params.append((w, b))
        in_dim = out_dim
        out_dim = hidden_dim if (li + 1) < num_layers - 1 else output_dim

    def head(key, dim):
        kw, kb = jax.random.split(key)
        bound = 1.0 / jnp.sqrt(dim)
        w = jax.random.uniform(kw, (dim, dim), jnp.float32, -bound, bound)
        b = jax.random.uniform(kb, (1, dim), jnp.float32, -bound, bound)
        return (w, b)

    key, kmu, kvar = jax.random.split(key, 3)
    return layer_params, head(kmu, output_dim), head(kvar, output_dim)


def reference_forward_f32(x, layer_params, mu_params, var_params, eps):
    """Pure f32 reference (exact module semantics)."""
    h = x
    n = len(layer_params)
    for i, (w, b) in enumerate(layer_params):
        h = h @ w + b
        if i != n - 1:
            h = jnp.maximum(h, 0.0)
    mu = h @ mu_params[0] + mu_params[1]
    logvar = h @ var_params[0] + var_params[1]
    out = mu + eps * jnp.exp(0.5 * logvar)
    div = jnp.mean(-0.5 * jnp.sum(1.0 + logvar - mu**2 - jnp.exp(logvar), axis=1))
    return out, KL_WEIGHT * div, div


def reference_forward_bf16(x, layer_params, mu_params, var_params, eps):
    """Reference matching the kernel's bf16-matmul / f32-accumulate numerics."""
    def mm(a, w):
        return jnp.dot(a.astype(jnp.bfloat16), w.astype(jnp.bfloat16),
                       preferred_element_type=jnp.float32)
    h = x
    n = len(layer_params)
    for i, (w, b) in enumerate(layer_params):
        h = mm(h, w) + b
        if i != n - 1:
            h = jnp.maximum(h, 0.0)
    mu = mm(h, mu_params[0]) + mu_params[1]
    logvar = mm(h, var_params[0]) + var_params[1]
    std = jnp.exp(0.5 * logvar)
    out = mu + eps * std
    div = jnp.mean(-0.5 * jnp.sum(1.0 + logvar - mu**2 - std * std, axis=1))
    return out, KL_WEIGHT * div, div


if __name__ == "__main__":
    # Small shapes consistent with the module; B chosen to exercise row padding, and a
    # small tile_b to exercise the multi-tile parallel grid.
    B, INPUT_DIM, OUTPUT_DIM, NUM_LAYERS = 37, 32, 16, 3

    key = jax.random.PRNGKey(0)
    key, kx, keps, kp = jax.random.split(key, 4)
    x = jax.random.normal(kx, (B, INPUT_DIM), jnp.float32)
    eps = jax.random.normal(keps, (B, OUTPUT_DIM), jnp.float32)  # reparameterization noise

    layer_params, mu_params, var_params = init_mlp_params(
        kp, INPUT_DIM, OUTPUT_DIM, NUM_LAYERS)

    packed = pack_params(layer_params, mu_params, var_params)  # hoisted out of per-call path

    out, loss, div = mlp_vae_forward(x, packed, eps, tile_b=16)
    out, loss, div = jax.block_until_ready((out, loss, div))

    # Structural check against a bf16-matched reference (tight tolerance).
    r_out, r_loss, r_div = reference_forward_bf16(x, layer_params, mu_params, var_params, eps)
    assert jnp.allclose(out, r_out, atol=2e-3, rtol=2e-3), float(jnp.max(jnp.abs(out - r_out)))
    assert jnp.allclose(div, r_div, atol=2e-3, rtol=2e-3)
    assert jnp.allclose(loss, r_loss, atol=2e-3, rtol=2e-3)

    # Sanity check against the exact f32 reference (bf16-rounding tolerance).
    f_out, f_loss, f_div = reference_forward_f32(x, layer_params, mu_params, var_params, eps)
    assert jnp.allclose(out, f_out, atol=5e-2, rtol=5e-2), float(jnp.max(jnp.abs(out - f_out)))
    assert jnp.allclose(div, f_div, atol=5e-2, rtol=5e-2)
    assert jnp.allclose(loss, f_loss, atol=5e-2, rtol=5e-2)

    print("KERNEL_OK")
</pallas_src>

<mosaic_0001>
module attributes {stable_mosaic.version = 11 : i64} {
  func.func @_mlp_vae_kernel(%arg0: i32, %arg1: memref<16x128xbf16, #tpu.memory_space<vmem>>, %arg2: memref<128x128xbf16, #tpu.memory_space<vmem>>, %arg3: memref<1x128xf32, #tpu.memory_space<vmem>>, %arg4: memref<128x128xbf16, #tpu.memory_space<vmem>>, %arg5: memref<1x128xf32, #tpu.memory_space<vmem>>, %arg6: memref<128x128xbf16, #tpu.memory_space<vmem>>, %arg7: memref<1x128xf32, #tpu.memory_space<vmem>>, %arg8: memref<128x256xbf16, #tpu.memory_space<vmem>>, %arg9: memref<1x256xf32, #tpu.memory_space<vmem>>, %arg10: memref<16x128xf32, #tpu.memory_space<vmem>>, %arg11: memref<16x128xf32, #tpu.memory_space<vmem>>, %arg12: memref<16x1xf32, #tpu.memory_space<vmem>>) attributes {dimension_semantics = [#tpu.dimension_semantics<parallel>], iteration_bounds = array<i64: 3>, scalar_prefetch = 0 : i64, scratch_operands = 0 : i64, tpu.core_type = #tpu.core_type<tc>, window_params = [{transform_indices = @transform_0, window_bounds = array<i64: 16, 128>}, {pipeline_mode = #tpu.pipeline_mode<synchronous>, transform_indices = @transform_1, window_bounds = array<i64: 128, 128>}, {pipeline_mode = #tpu.pipeline_mode<synchronous>, transform_indices = @transform_2, window_bounds = array<i64: 1, 128>}, {pipeline_mode = #tpu.pipeline_mode<synchronous>, transform_indices = @transform_3, window_bounds = array<i64: 128, 128>}, {pipeline_mode = #tpu.pipeline_mode<synchronous>, transform_indices = @transform_4, window_bounds = array<i64: 1, 128>}, {pipeline_mode = #tpu.pipeline_mode<synchronous>, transform_indices = @transform_5, window_bounds = array<i64: 128, 128>}, {pipeline_mode = #tpu.pipeline_mode<synchronous>, transform_indices = @transform_6, window_bounds = array<i64: 1, 128>}, {pipeline_mode = #tpu.pipeline_mode<synchronous>, transform_indices = @transform_7, window_bounds = array<i64: 128, 256>}, {pipeline_mode = #tpu.pipeline_mode<synchronous>, transform_indices = @transform_8, window_bounds = array<i64: 1, 256>}, {transform_indices = @transform_9, window_bounds = array<i64: 16, 128>}, {transform_indices = @transform_10, window_bounds = array<i64: 16, 128>}, {transform_indices = @transform_11, window_bounds = array<i64: 16, 1>}]} {
    %c0 = arith.constant 0 : index
    %c0_0 = arith.constant 0 : index
    %0 = vector.load %arg1[%c0, %c0_0] : memref<16x128xbf16, #tpu.memory_space<vmem>>, vector<16x128xbf16>
    %c0_1 = arith.constant 0 : index
    %c0_2 = arith.constant 0 : index
    %1 = vector.load %arg2[%c0_1, %c0_2] : memref<128x128xbf16, #tpu.memory_space<vmem>>, vector<128x128xbf16>
    %cst = arith.constant dense<0.000000e+00> : vector<16x128xf32>
    %2 = tpu.matmul %0, %1, %cst {dimension_numbers = #tpu.dot_dimension_numbers<[1], [0], [0], [1], [0, 0, 1, 1], [], []>} : vector<16x128xbf16>, vector<128x128xbf16>, vector<16x128xf32> -> vector<16x128xf32>
    %c0_3 = arith.constant 0 : index
    %c0_4 = arith.constant 0 : index
    %3 = vector.load %arg3[%c0_3, %c0_4] : memref<1x128xf32, #tpu.memory_space<vmem>>, vector<1x128xf32>
    %4 = vector.broadcast %3 : vector<1x128xf32> to vector<16x128xf32>
    %5 = arith.addf %2, %4 : vector<16x128xf32>
    %cst_5 = arith.constant 0.000000e+00 : f32
    %6 = vector.broadcast %cst_5 : f32 to vector<16x128xf32>
    %7 = arith.maximumf %5, %6 : vector<16x128xf32>
    %8 = arith.truncf %7 : vector<16x128xf32> to vector<16x128xbf16>
    %c0_6 = arith.constant 0 : index
    %c0_7 = arith.constant 0 : index
    %9 = vector.load %arg4[%c0_6, %c0_7] : memref<128x128xbf16, #tpu.memory_space<vmem>>, vector<128x128xbf16>
    %cst_8 = arith.constant dense<0.000000e+00> : vector<16x128xf32>
    %10 = tpu.matmul %8, %9, %cst_8 {dimension_numbers = #tpu.dot_dimension_numbers<[1], [0], [0], [1], [0, 0, 1, 1], [], []>} : vector<16x128xbf16>, vector<128x128xbf16>, vector<16x128xf32> -> vector<16x128xf32>
    %c0_9 = arith.constant 0 : index
    %c0_10 = arith.constant 0 : index
    %11 = vector.load %arg5[%c0_9, %c0_10] : memref<1x128xf32, #tpu.memory_space<vmem>>, vector<1x128xf32>
    %12 = vector.broadcast %11 : vector<1x128xf32> to vector<16x128xf32>
    %13 = arith.addf %10, %12 : vector<16x128xf32>
    %cst_11 = arith.constant 0.000000e+00 : f32
    %14 = vector.broadcast %cst_11 : f32 to vector<16x128xf32>
    %15 = arith.maximumf %13, %14 : vector<16x128xf32>
    %16 = arith.truncf %15 : vector<16x128xf32> to vector<16x128xbf16>
    %c0_12 = arith.constant 0 : index
    %c0_13 = arith.constant 0 : index
    %17 = vector.load %arg6[%c0_12, %c0_13] : memref<128x128xbf16, #tpu.memory_space<vmem>>, vector<128x128xbf16>
    %cst_14 = arith.constant dense<0.000000e+00> : vector<16x128xf32>
    %18 = tpu.matmul %16, %17, %cst_14 {dimension_numbers = #tpu.dot_dimension_numbers<[1], [0], [0], [1], [0, 0, 1, 1], [], []>} : vector<16x128xbf16>, vector<128x128xbf16>, vector<16x128xf32> -> vector<16x128xf32>
    %c0_15 = arith.constant 0 : index
    %c0_16 = arith.constant 0 : index
    %19 = vector.load %arg7[%c0_15, %c0_16] : memref<1x128xf32, #tpu.memory_space<vmem>>, vector<1x128xf32>
    %20 = vector.broadcast %19 : vector<1x128xf32> to vector<16x128xf32>
    %21 = arith.addf %18, %20 : vector<16x128xf32>
    %22 = arith.truncf %21 : vector<16x128xf32> to vector<16x128xbf16>
    %c0_17 = arith.constant 0 : index
    %c0_18 = arith.constant 0 : index
    %23 = vector.load %arg8[%c0_17, %c0_18] : memref<128x256xbf16, #tpu.memory_space<vmem>>, vector<128x256xbf16>
    %cst_19 = arith.constant dense<0.000000e+00> : vector<16x256xf32>
    %24 = tpu.matmul %22, %23, %cst_19 {dimension_numbers = #tpu.dot_dimension_numbers<[1], [0], [0], [1], [0, 0, 1, 1], [], []>} : vector<16x128xbf16>, vector<128x256xbf16>, vector<16x256xf32> -> vector<16x256xf32>
    %c0_20 = arith.constant 0 : index
    %c0_21 = arith.constant 0 : index
    %25 = vector.load %arg9[%c0_20, %c0_21] : memref<1x256xf32, #tpu.memory_space<vmem>>, vector<1x256xf32>
    %26 = vector.broadcast %25 : vector<1x256xf32> to vector<16x256xf32>
    %27 = arith.addf %24, %26 : vector<16x256xf32>
    %28 = vector.extract_strided_slice %27 {offsets = [0, 0], sizes = [16, 128], strides = [1, 1]} : vector<16x256xf32> to vector<16x128xf32>
    %29 = vector.extract_strided_slice %27 {offsets = [0, 128], sizes = [16, 128], strides = [1, 1]} : vector<16x256xf32> to vector<16x128xf32>
    %cst_22 = arith.constant 5.000000e-01 : f32
    %30 = vector.broadcast %cst_22 : f32 to vector<16x128xf32>
    %31 = arith.mulf %30, %29 : vector<16x128xf32>
    %32 = math.exp %31 : vector<16x128xf32>
    %c0_23 = arith.constant 0 : index
    %c0_24 = arith.constant 0 : index
    %33 = vector.load %arg10[%c0_23, %c0_24] : memref<16x128xf32, #tpu.memory_space<vmem>>, vector<16x128xf32>
    %34 = arith.mulf %33, %32 : vector<16x128xf32>
    %35 = arith.addf %28, %34 : vector<16x128xf32>
    %c0_25 = arith.constant 0 : index
    %c0_26 = arith.constant 0 : index
    %36 = vector.load %arg11[%c0_25, %c0_26] : memref<16x128xf32, #tpu.memory_space<vmem>>, vector<16x128xf32>
    tpu.vector_store %arg11[%c0_25, %c0_26], %35 {strides = array<i32>} : memref<16x128xf32, #tpu.memory_space<vmem>>, vector<16x128xf32>,
    %cst_27 = arith.constant 1.000000e+00 : f32
    %37 = vector.broadcast %cst_27 : f32 to vector<16x128xf32>
    %38 = arith.addf %37, %29 : vector<16x128xf32>
    %39 = arith.mulf %28, %28 : vector<16x128xf32>
    %40 = arith.subf %38, %39 : vector<16x128xf32>
    %41 = arith.mulf %32, %32 : vector<16x128xf32>
    %42 = arith.subf %40, %41 : vector<16x128xf32>
    %cst_28 = arith.constant dense<0.000000e+00> : vector<16xf32>
    %43 = vector.multi_reduction <add>, %42, %cst_28 [1] : vector<16x128xf32> to vector<16xf32>
    %44 = vector.shape_cast %43 : vector<16xf32> to vector<16x1xf32>
    %cst_29 = arith.constant -5.000000e-01 : f32
    %45 = vector.broadcast %cst_29 : f32 to vector<16x1xf32>
    %46 = arith.mulf %45, %44 : vector<16x1xf32>
    %c0_30 = arith.constant 0 : index
    %c0_31 = arith.constant 0 : index
    %47 = vector.load %arg12[%c0_30, %c0_31] : memref<16x1xf32, #tpu.memory_space<vmem>>, vector<16x1xf32>
    tpu.vector_store %arg12[%c0_30, %c0_31], %46 {strides = array<i32>} : memref<16x1xf32, #tpu.memory_space<vmem>>, vector<16x1xf32>,
    return
  }
  func.func @transform_0(%arg0: i32) -> (i32, i32) {
    %c0_i32 = arith.constant 0 : i32
    %c0_i32_0 = arith.constant 0 : i32
    return %arg0, %c0_i32 : i32, i32
  }
  func.func @transform_1(%arg0: i32) -> (i32, i32) {
    %c0_i32 = arith.constant 0 : i32
    %c0_i32_0 = arith.constant 0 : i32
    %c0_i32_1 = arith.constant 0 : i32
    return %c0_i32, %c0_i32_0 : i32, i32
  }
  func.func @transform_2(%arg0: i32) -> (i32, i32) {
    %c0_i32 = arith.constant 0 : i32
    %c0_i32_0 = arith.constant 0 : i32
    %c0_i32_1 = arith.constant 0 : i32
    return %c0_i32, %c0_i32_0 : i32, i32
  }
  func.func @transform_3(%arg0: i32) -> (i32, i32) {
    %c0_i32 = arith.constant 0 : i32
    %c0_i32_0 = arith.constant 0 : i32
    %c0_i32_1 = arith.constant 0 : i32
    return %c0_i32, %c0_i32_0 : i32, i32
  }
  func.func @transform_4(%arg0: i32) -> (i32, i32) {
    %c0_i32 = arith.constant 0 : i32
    %c0_i32_0 = arith.constant 0 : i32
    %c0_i32_1 = arith.constant 0 : i32
    return %c0_i32, %c0_i32_0 : i32, i32
  }
  func.func @transform_5(%arg0: i32) -> (i32, i32) {
    %c0_i32 = arith.constant 0 : i32
    %c0_i32_0 = arith.constant 0 : i32
    %c0_i32_1 = arith.constant 0 : i32
    return %c0_i32, %c0_i32_0 : i32, i32
  }
  func.func @transform_6(%arg0: i32) -> (i32, i32) {
    %c0_i32 = arith.constant 0 : i32
    %c0_i32_0 = arith.constant 0 : i32
    %c0_i32_1 = arith.constant 0 : i32
    return %c0_i32, %c0_i32_0 : i32, i32
  }
  func.func @transform_7(%arg0: i32) -> (i32, i32) {
    %c0_i32 = arith.constant 0 : i32
    %c0_i32_0 = arith.constant 0 : i32
    %c0_i32_1 = arith.constant 0 : i32
    return %c0_i32, %c0_i32_0 : i32, i32
  }
  func.func @transform_8(%arg0: i32) -> (i32, i32) {
    %c0_i32 = arith.constant 0 : i32
    %c0_i32_0 = arith.constant 0 : i32
    %c0_i32_1 = arith.constant 0 : i32
    return %c0_i32, %c0_i32_0 : i32, i32
  }
  func.func @transform_9(%arg0: i32) -> (i32, i32) {
    %c0_i32 = arith.constant 0 : i32
    %c0_i32_0 = arith.constant 0 : i32
    return %arg0, %c0_i32 : i32, i32
  }
  func.func @transform_10(%arg0: i32) -> (i32, i32) {
    %c0_i32 = arith.constant 0 : i32
    %c0_i32_0 = arith.constant 0 : i32
    return %arg0, %c0_i32 : i32, i32
  }
  func.func @transform_11(%arg0: i32) -> (i32, i32) {
    %c0_i32 = arith.constant 0 : i32
    %c0_i32_0 = arith.constant 0 : i32
    return %arg0, %c0_i32 : i32, i32
  }
}

module attributes {stable_mosaic.version = 11 : i64} {
  func.func @_mlp_vae_kernel(%arg0: i32, %arg1: memref<16x128xbf16, #tpu.memory_space<vmem>>, %arg2: memref<128x128xbf16, #tpu.memory_space<vmem>>, %arg3: memref<1x128xf32, #tpu.memory_space<vmem>>, %arg4: memref<128x128xbf16, #tpu.memory_space<vmem>>, %arg5: memref<1x128xf32, #tpu.memory_space<vmem>>, %arg6: memref<128x128xbf16, #tpu.memory_space<vmem>>, %arg7: memref<1x128xf32, #tpu.memory_space<vmem>>, %arg8: memref<128x256xbf16, #tpu.memory_space<vmem>>, %arg9: memref<1x256xf32, #tpu.memory_space<vmem>>, %arg10: memref<16x128xf32, #tpu.memory_space<vmem>>, %arg11: memref<16x128xf32, #tpu.memory_space<vmem>>, %arg12: memref<16x1xf32, #tpu.memory_space<vmem>>) attributes {dimension_semantics = [#tpu.dimension_semantics<parallel>], iteration_bounds = array<i64: 3>, scalar_prefetch = 0 : i64, scratch_operands = 0 : i64, tpu.core_type = #tpu.core_type<tc>, window_params = [{transform_indices = @transform_0, window_bounds = array<i64: 16, 128>}, {pipeline_mode = #tpu.pipeline_mode<synchronous>, transform_indices = @transform_1, window_bounds = array<i64: 128, 128>}, {pipeline_mode = #tpu.pipeline_mode<synchronous>, transform_indices = @transform_2, window_bounds = array<i64: 1, 128>}, {pipeline_mode = #tpu.pipeline_mode<synchronous>, transform_indices = @transform_3, window_bounds = array<i64: 128, 128>}, {pipeline_mode = #tpu.pipeline_mode<synchronous>, transform_indices = @transform_4, window_bounds = array<i64: 1, 128>}, {pipeline_mode = #tpu.pipeline_mode<synchronous>, transform_indices = @transform_5, window_bounds = array<i64: 128, 128>}, {pipeline_mode = #tpu.pipeline_mode<synchronous>, transform_indices = @transform_6, window_bounds = array<i64: 1, 128>}, {pipeline_mode = #tpu.pipeline_mode<synchronous>, transform_indices = @transform_7, window_bounds = array<i64: 128, 256>}, {pipeline_mode = #tpu.pipeline_mode<synchronous>, transform_indices = @transform_8, window_bounds = array<i64: 1, 256>}, {transform_indices = @transform_9, window_bounds = array<i64: 16, 128>}, {transform_indices = @transform_10, window_bounds = array<i64: 16, 128>}, {transform_indices = @transform_11, window_bounds = array<i64: 16, 1>}]} {
    %c0 = arith.constant 0 : index
    %c0_0 = arith.constant 0 : index
    %0 = vector.load %arg1[%c0, %c0_0] : memref<16x128xbf16, #tpu.memory_space<vmem>>, vector<16x128xbf16>
    %c0_1 = arith.constant 0 : index
    %c0_2 = arith.constant 0 : index
    %1 = vector.load %arg2[%c0_1, %c0_2] : memref<128x128xbf16, #tpu.memory_space<vmem>>, vector<128x128xbf16>
    %cst = arith.constant dense<0.000000e+00> : vector<16x128xf32>
    %2 = tpu.matmul %0, %1, %cst {dimension_numbers = #tpu.dot_dimension_numbers<[1], [0], [0], [1], [0, 0, 1, 1], [], []>} : vector<16x128xbf16>, vector<128x128xbf16>, vector<16x128xf32> -> vector<16x128xf32>
    %c0_3 = arith.constant 0 : index
    %c0_4 = arith.constant 0 : index
    %3 = vector.load %arg3[%c0_3, %c0_4] : memref<1x128xf32, #tpu.memory_space<vmem>>, vector<1x128xf32>
    %4 = vector.broadcast %3 : vector<1x128xf32> to vector<16x128xf32>
    %5 = arith.addf %2, %4 : vector<16x128xf32>
    %cst_5 = arith.constant 0.000000e+00 : f32
    %6 = vector.broadcast %cst_5 : f32 to vector<16x128xf32>
    %7 = arith.maximumf %5, %6 : vector<16x128xf32>
    %8 = arith.truncf %7 : vector<16x128xf32> to vector<16x128xbf16>
    %c0_6 = arith.constant 0 : index
    %c0_7 = arith.constant 0 : index
    %9 = vector.load %arg4[%c0_6, %c0_7] : memref<128x128xbf16, #tpu.memory_space<vmem>>, vector<128x128xbf16>
    %cst_8 = arith.constant dense<0.000000e+00> : vector<16x128xf32>
    %10 = tpu.matmul %8, %9, %cst_8 {dimension_numbers = #tpu.dot_dimension_numbers<[1], [0], [0], [1], [0, 0, 1, 1], [], []>} : vector<16x128xbf16>, vector<128x128xbf16>, vector<16x128xf32> -> vector<16x128xf32>
    %c0_9 = arith.constant 0 : index
    %c0_10 = arith.constant 0 : index
    %11 = vector.load %arg5[%c0_9, %c0_10] : memref<1x128xf32, #tpu.memory_space<vmem>>, vector<1x128xf32>
    %12 = vector.broadcast %11 : vector<1x128xf32> to vector<16x128xf32>
    %13 = arith.addf %10, %12 : vector<16x128xf32>
    %cst_11 = arith.constant 0.000000e+00 : f32
    %14 = vector.broadcast %cst_11 : f32 to vector<16x128xf32>
    %15 = arith.maximumf %13, %14 : vector<16x128xf32>
    %16 = arith.truncf %15 : vector<16x128xf32> to vector<16x128xbf16>
    %c0_12 = arith.constant 0 : index
    %c0_13 = arith.constant 0 : index
    %17 = vector.load %arg6[%c0_12, %c0_13] : memref<128x128xbf16, #tpu.memory_space<vmem>>, vector<128x128xbf16>
    %cst_14 = arith.constant dense<0.000000e+00> : vector<16x128xf32>
    %18 = tpu.matmul %16, %17, %cst_14 {dimension_numbers = #tpu.dot_dimension_numbers<[1], [0], [0], [1], [0, 0, 1, 1], [], []>} : vector<16x128xbf16>, vector<128x128xbf16>, vector<16x128xf32> -> vector<16x128xf32>
    %c0_15 = arith.constant 0 : index
    %c0_16 = arith.constant 0 : index
    %19 = vector.load %arg7[%c0_15, %c0_16] : memref<1x128xf32, #tpu.memory_space<vmem>>, vector<1x128xf32>
    %20 = vector.broadcast %19 : vector<1x128xf32> to vector<16x128xf32>
    %21 = arith.addf %18, %20 : vector<16x128xf32>
    %22 = arith.truncf %21 : vector<16x128xf32> to vector<16x128xbf16>
    %c0_17 = arith.constant 0 : index
    %c0_18 = arith.constant 0 : index
    %23 = vector.load %arg8[%c0_17, %c0_18] : memref<128x256xbf16, #tpu.memory_space<vmem>>, vector<128x256xbf16>
    %cst_19 = arith.constant dense<0.000000e+00> : vector<16x256xf32>
    %24 = tpu.matmul %22, %23, %cst_19 {dimension_numbers = #tpu.dot_dimension_numbers<[1], [0], [0], [1], [0, 0, 1, 1], [], []>} : vector<16x128xbf16>, vector<128x256xbf16>, vector<16x256xf32> -> vector<16x256xf32>
    %c0_20 = arith.constant 0 : index
    %c0_21 = arith.constant 0 : index
    %25 = vector.load %arg9[%c0_20, %c0_21] : memref<1x256xf32, #tpu.memory_space<vmem>>, vector<1x256xf32>
    %26 = vector.broadcast %25 : vector<1x256xf32> to vector<16x256xf32>
    %27 = arith.addf %24, %26 : vector<16x256xf32>
    %28 = vector.extract_strided_slice %27 {offsets = [0, 0], sizes = [16, 128], strides = [1, 1]} : vector<16x256xf32> to vector<16x128xf32>
    %29 = vector.extract_strided_slice %27 {offsets = [0, 128], sizes = [16, 128], strides = [1, 1]} : vector<16x256xf32> to vector<16x128xf32>
    %cst_22 = arith.constant 5.000000e-01 : f32
    %30 = vector.broadcast %cst_22 : f32 to vector<16x128xf32>
    %31 = arith.mulf %30, %29 : vector<16x128xf32>
    %32 = math.exp %31 : vector<16x128xf32>
    %c0_23 = arith.constant 0 : index
    %c0_24 = arith.constant 0 : index
    %33 = vector.load %arg10[%c0_23, %c0_24] : memref<16x128xf32, #tpu.memory_space<vmem>>, vector<16x128xf32>
    %34 = arith.mulf %33, %32 : vector<16x128xf32>
    %35 = arith.addf %28, %34 : vector<16x128xf32>
    %c0_25 = arith.constant 0 : index
    %c0_26 = arith.constant 0 : index
    %36 = vector.load %arg11[%c0_25, %c0_26] : memref<16x128xf32, #tpu.memory_space<vmem>>, vector<16x128xf32>
    tpu.vector_store %arg11[%c0_25, %c0_26], %35 {strides = array<i32>} : memref<16x128xf32, #tpu.memory_space<vmem>>, vector<16x128xf32>,
    %cst_27 = arith.constant 1.000000e+00 : f32
    %37 = vector.broadcast %cst_27 : f32 to vector<16x128xf32>
    %38 = arith.addf %37, %29 : vector<16x128xf32>
    %39 = arith.mulf %28, %28 : vector<16x128xf32>
    %40 = arith.subf %38, %39 : vector<16x128xf32>
    %41 = arith.mulf %32, %32 : vector<16x128xf32>
    %42 = arith.subf %40, %41 : vector<16x128xf32>
    %cst_28 = arith.constant dense<0.000000e+00> : vector<16xf32>
    %43 = vector.multi_reduction <add>, %42, %cst_28 [1] : vector<16x128xf32> to vector<16xf32>
    %44 = vector.shape_cast %43 : vector<16xf32> to vector<16x1xf32>
    %cst_29 = arith.constant -5.000000e-01 : f32
    %45 = vector.broadcast %cst_29 : f32 to vector<16x1xf32>
    %46 = arith.mulf %45, %44 : vector<16x1xf32>
    %c0_30 = arith.constant 0 : index
    %c0_31 = arith.constant 0 : index
    %47 = vector.load %arg12[%c0_30, %c0_31] : memref<16x1xf32, #tpu.memory_space<vmem>>, vector<16x1xf32>
    tpu.vector_store %arg12[%c0_30, %c0_31], %46 {strides = array<i32>} : memref<16x1xf32, #tpu.memory_space<vmem>>, vector<16x1xf32>,
    return
  }
  func.func @transform_0(%arg0: i32) -> (i32, i32) {
    %c0_i32 = arith.constant 0 : i32
    %c0_i32_0 = arith.constant 0 : i32
    return %arg0, %c0_i32 : i32, i32
  }
  func.func @transform_1(%arg0: i32) -> (i32, i32) {
    %c0_i32 = arith.constant 0 : i32
    %c0_i32_0 = arith.constant 0 : i32
    %c0_i32_1 = arith.constant 0 : i32
    return %c0_i32, %c0_i32_0 : i32, i32
  }
  func.func @transform_2(%arg0: i32) -> (i32, i32) {
    %c0_i32 = arith.constant 0 : i32
    %c0_i32_0 = arith.constant 0 : i32
    %c0_i32_1 = arith.constant 0 : i32
    return %c0_i32, %c0_i32_0 : i32, i32
  }
  func.func @transform_3(%arg0: i32) -> (i32, i32) {
    %c0_i32 = arith.constant 0 : i32
    %c0_i32_0 = arith.constant 0 : i32
    %c0_i32_1 = arith.constant 0 : i32
    return %c0_i32, %c0_i32_0 : i32, i32
  }
  func.func @transform_4(%arg0: i32) -> (i32, i32) {
    %c0_i32 = arith.constant 0 : i32
    %c0_i32_0 = arith.constant 0 : i32
    %c0_i32_1 = arith.constant 0 : i32
    return %c0_i32, %c0_i32_0 : i32, i32
  }
  func.func @transform_5(%arg0: i32) -> (i32, i32) {
    %c0_i32 = arith.constant 0 : i32
    %c0_i32_0 = arith.constant 0 : i32
    %c0_i32_1 = arith.constant 0 : i32
    return %c0_i32, %c0_i32_0 : i32, i32
  }
  func.func @transform_6(%arg0: i32) -> (i32, i32) {
    %c0_i32 = arith.constant 0 : i32
    %c0_i32_0 = arith.constant 0 : i32
    %c0_i32_1 = arith.constant 0 : i32
    return %c0_i32, %c0_i32_0 : i32, i32
  }
  func.func @transform_7(%arg0: i32) -> (i32, i32) {
    %c0_i32 = arith.constant 0 : i32
    %c0_i32_0 = arith.constant 0 : i32
    %c0_i32_1 = arith.constant 0 : i32
    return %c0_i32, %c0_i32_0 : i32, i32
  }
  func.func @transform_8(%arg0: i32) -> (i32, i32) {
    %c0_i32 = arith.constant 0 : i32
    %c0_i32_0 = arith.constant 0 : i32
    %c0_i32_1 = arith.constant 0 : i32
    return %c0_i32, %c0_i32_0 : i32, i32
  }
  func.func @transform_9(%arg0: i32) -> (i32, i32) {
    %c0_i32 = arith.constant 0 : i32
    %c0_i32_0 = arith.constant 0 : i32
    return %arg0, %c0_i32 : i32, i32
  }
  func.func @transform_10(%arg0: i32) -> (i32, i32) {
    %c0_i32 = arith.constant 0 : i32
    %c0_i32_0 = arith.constant 0 : i32
    return %arg0, %c0_i32 : i32, i32
  }
  func.func @transform_11(%arg0: i32) -> (i32, i32) {
    %c0_i32 = arith.constant 0 : i32
    %c0_i32_0 = arith.constant 0 : i32
    return %arg0, %c0_i32 : i32, i32
  }
}

</mosaic_0001>

<bundles_post_ra>
// kernel: tpu_custom_call.1
= control target key start
LH: loop header
LB: loop body
LE: loop exit
PB: predicated region body
PF: predicated region fallthrough
CT: control target
= control target key end

     0   :  { %s2198_s0 = inlined_call_operand.hbm [shape: bf16[48,128], index: 0, kind: input, shape index: {}]   ;;  %s2199_s1 = inlined_call_operand.hbm [shape: bf16[128,128], index: 1, kind: input, shape index: {}]   ;;  %s2200_s2 = inlined_call_operand.vmem [shape: f32[1,128], index: 2, kind: input, shape index: {}]   ;;  %s2201_s3 = inlined_call_operand.hbm [shape: bf16[128,128], index: 3, kind: input, shape index: {}]   ;;  %s2202_s4 = inlined_call_operand.vmem [shape: f32[1,128], index: 4, kind: input, shape index: {}]   ;;  %s2203_s5 = inlined_call_operand.hbm [shape: bf16[128,128], index: 5, kind: input, shape index: {}]   ;;  %s2204_s6 = inlined_call_operand.vmem [shape: f32[1,128], index: 6, kind: input, shape index: {}]   ;;  %s2205_s7 = inlined_call_operand.hbm [shape: bf16[128,256], index: 7, kind: input, shape index: {}]   ;;  %s2206_s8 = inlined_call_operand.vmem [shape: f32[1,256], index: 8, kind: input, shape index: {}]   ;;  %s2207_s9 = inlined_call_operand.hbm [shape: f32[48,128], index: 9, kind: input, shape index: {}]   ;;  %s2208_s10 = inlined_call_operand.hbm [shape: f32[48,128], index: 10, kind: output, shape index: {0}]   ;;  %s2209_s11 = inlined_call_operand.vmem [shape: f32[48,1], index: 11, kind: output, shape index: {1}]  }
   0x1   :  { %2220 = sst [smem:[#allocation22_spill]] %s2198_s0 }
   0x2   :  { %2221 = sst [smem:[#allocation23_spill]] %s2199_s1 }
   0x3   :  { %2222 = sst [smem:[#allocation24_spill]] %s2201_s3 }
   0x4   :  { %2223 = sst [smem:[#allocation25_spill]] %s2203_s5 }
   0x5   :  { %2224 = sst [smem:[#allocation26_spill]] %s2205_s7 }
   0x6   :  { %17 = vsyncpa [#allocation3], 0 }
   0x7   :  { %19 = vsyncpa [#allocation3 + $0x1], 0 }
   0x8   :  { %20 = vsyncpa [#allocation6], 0 }
   0x9   :  { %21 = vsyncpa [#allocation9], 0 }
   0xa   :  { %22 = vsyncpa [#allocation12], 0 }
   0xb   :  { %24 = vsyncpa [#allocation12 + $0x1], 0 }
   0xc   :  { %25 = vsyncpa [#allocation4], 0 }
   0xd   :  { %27 = vsyncpa [#allocation4 + $0x1], 0  ;;  %s1868_s17 = smov 0   ;;  %s1870_s18 = smov 0  }
   0xe   :  { %s1872_s19 = smov 0   ;;  %s1874_s20 = smov 0  }
   0xf LB: > { %2225 = sst [smem:[#allocation19_spill]] %s1786_s19  ;;  %s1889_s21 = sadd.s32 4294967295, %s1790_s20   ;;  %s1790_s20 = sphi %s1874_s20, %s2252_s20   ;;  %s1786_s19 = sphi %s1872_s19, %s2254_s19   ;;  %s1782_s18 = sphi %s1870_s18, %s2256_s18   ;;  %s1778_s17 = sphi %s1868_s17, %s2255_s17  }
  0x10   : > { %s1238_s22 = sadd.s32 4294967294, %s1790_s20   ;;  %p53_p0 = scmp.ne.s32.totalorder %s1782_s18, %s1778_s17 }
  0x11   : > { %p2210_p1 = scmp.eq.s32.totalorder %s1889_s21, 0  ;;  %p271_p2 = scmp.eq.s32.totalorder %s1889_s21, 2 }
  0x12   : > { %p277_p3 = scmp.eq.s32.totalorder %s1238_s22, 2  ;;  %p1239_p5 = scmp.ge.s32.totalorder %s1790_s20, 1 }
  0x13   : > { %p1898_p4 = por %p2210_p1, %p53_p0  ;;  %p310_p7 = scmp.lt.s32.totalorder %s1790_s20, 4 }
  0x14   : > { %p1903_p6 = por %p277_p3, %p53_p0  ;;  %s1792_s26 = smov [#allocation5]  }
  0x15   : > { %s2226_s23 = scalar_select %p1898_p4, 1, 0 }
  0x16   : > { %s2227_s24 = scalar_select %p1903_p6, 1, 0 }
  0x17   : > { %p1908_p8 = pnand %p1239_p5, %p310_p7  ;;  %s322_s27 = sshll.u32 %s1792_s26, 4  ;;  %s323_s27 = int_to_ptr.vmem [resolvable:$true] %s322_s27 }
  0x18   : > { %s1793_s29 = smov [#allocation8]   ;;  %s1794_s12 = smov [#allocation7]  }
  0x19   : > { %p1422_p9 = pneg %p1908_p8  ;;  %s354_s30 = sshll.u32 %s1793_s29, 4  ;;  %s355_s30 = int_to_ptr.vmem [resolvable:$true] %s354_s30 }
  0x1a   : > { %s338_s13 = sshll.u32 %s1794_s12, 4  ;;  %s1565_s14 = scalar_lea.vmem %s323_s27, 1024  ;;  %s339_s13 = int_to_ptr.vmem [resolvable:$true] %s338_s13 }
  0x1b   : > { %p1916_p10 = pnand %p1422_p9, %p2210_p1  ;;  %p1566_p12 = scmp.ne.s32.totalorder %s323_s27, %s1565_s14 }
  0x1c   : > { %p1573_p3 = scmp.lt.s32.totalorder %s323_s27, %s323_s27  ;;  %p1574_p5 = scmp.lt.s32.totalorder %s1565_s14, %s1565_s14 }
  0x1d   : > { %p1556_p11 = pneg %p1916_p10 }
  0x1e   : > { %p1575_p7 = por %p1574_p5, %p1573_p3 }
  0x1f   : > { %p1568_p13 = pnand %p1566_p12, %p1556_p11 }
  0x21   : > { %p1569_p0 = pneg %p1568_p13 }
  0x23   : > { %p1576_p9 = pnand %p1575_p7, %p1569_p0 }
  0x25   : > { %1579 = shalt.err (!%p1576_p9)
}
  0x26   : > { %s2211_s15 = smov 64   ;;  %s2212_s16 = smov 4  }
  0x27   : > { %s2230_s1 = sld [smem:[#allocation23_spill]]  ;;  %s1591_s29 = scalar_lea.vmem %s355_s30, 1024 }
  0x28   : > { %p1592_p12 = scmp.ne.s32.totalorder %s355_s30, %s1591_s29  ;;  %p1599_p0 = scmp.lt.s32.totalorder %s355_s30, %s355_s30 }
  0x29   : > { %p1600_p5 = scmp.lt.s32.totalorder %s1591_s29, %s1591_s29 }
  0x2a   : > { %p1594_p13 = pnand %p1592_p12, %p1556_p11 }
  0x2b   : > { %p1601_p7 = por %p1600_p5, %p1599_p0 }
  0x2c   : > { %p1595_p3 = pneg %p1594_p13 }
  0x2d   : > { %1425 = dma.hbm_to_vmem [thread:$0]  (!%p1916_p10), %s2230_s1, 1024, %s323_s27, [#allocation6], %s2211_s15, %s2211_s15, %s2212_s16  }
  0x2e   : > { %p1602_p9 = pnand %p1601_p7, %p1595_p3 }
  0x30   : > { %1605 = shalt.err (!%p1602_p9)
}
  0x31   : > { %s2231_s5 = sld [smem:[#allocation25_spill]]  ;;  %s1617_s27 = scalar_lea.vmem %s339_s13, 1024 }
  0x32   : > { %p1618_p1 = scmp.ne.s32.totalorder %s339_s13, %s1617_s27  ;;  %p1625_p0 = scmp.lt.s32.totalorder %s339_s13, %s339_s13 }
  0x33   : > { %p1626_p3 = scmp.lt.s32.totalorder %s1617_s27, %s1617_s27 }
  0x34   : > { %p1620_p12 = pnand %p1618_p1, %p1556_p11 }
  0x35   : > { %p1627_p5 = por %p1626_p3, %p1625_p0 }
  0x36   : > { %p1621_p13 = pneg %p1620_p12 }
  0x37   : > { %1431 = dma.hbm_to_vmem [thread:$0]  (!%p1916_p10), %s2231_s5, 1024, %s355_s30, [#allocation9], %s2211_s15, %s2211_s15, %s2212_s16  }
  0x38   : > { %p1628_p7 = pnand %p1627_p5, %p1621_p13 }
  0x3a   : > { %1631 = shalt.err (!%p1628_p7)
}
  0x3b   : > { %s2232_s3 = sld [smem:[#allocation24_spill]]  ;;  %s1797_s30 = smov [#allocation10]  }
  0x3c   : > { %s370_s29 = sshll.u32 %s1797_s30, 4  ;;  %s371_s29 = int_to_ptr.vmem [resolvable:$true] %s370_s29 }
  0x3d   : > { %s1643_s12 = scalar_lea.vmem %s371_s29, 2048  ;;  %p1651_p13 = scmp.lt.s32.totalorder %s371_s29, %s371_s29 }
  0x3e   : > { %p1644_p1 = scmp.ne.s32.totalorder %s371_s29, %s1643_s12  ;;  %p1652_p0 = scmp.lt.s32.totalorder %s1643_s12, %s1643_s12 }
  0x40   : > { %p1646_p9 = pnand %p1644_p1, %p1556_p11  ;;  %p1653_p3 = por %p1652_p0, %p1651_p13 }
  0x41   : > { %1428 = dma.hbm_to_vmem [thread:$0]  (!%p1916_p10), %s2232_s3, 1024, %s339_s13, [#allocation6], %s2211_s15, %s2211_s15, %s2212_s16  }
  0x42   : > { %p1647_p12 = pneg %p1646_p9 }
  0x44   : > { %p1654_p5 = pnand %p1653_p3, %p1647_p12 }
  0x46   : > { %1657 = shalt.err (!%p1654_p5)
}
  0x47   : > { %s2213_s14 = smov 128   ;;  %s2214_s13 = smov 8  }
  0x48   : > { %s2233_s7 = sld [smem:[#allocation26_spill]]  ;;  %s1967_s26 = sadd.s32 1, %s1790_s20  }
  0x49   : > { %2234 = sst [smem:[#allocation20_spill]] %s1967_s26  ;;  %s37_s30 = ssub.s32 %s1790_s20, %s1967_s26 }
  0x4a   : > { %p38_p11 = scmp.eq.s32.totalorder %s37_s30, 0  ;;  %s40_s12 = sadd.s32 1, %s1786_s19 }
  0x4b   : > { %p47_p7 = scmp.ne.s32.totalorder %s1786_s19, %s1782_s18  ;;  %p48_p1 = scmp.eq.s32.totalorder %s1790_s20, 0 }
  0x4c   : > { %s1976_s15 = scalar_select %p38_p11, %s1786_s19, %s40_s12  }
  0x4d   : > { %p49_p9 = por %p48_p1, %p47_p7  ;;  %p1980_p12 = por %p271_p2, %p47_p7 }
  0x4e   : > { %1434 = dma.hbm_to_vmem [thread:$0]  (!%p1916_p10), %s2233_s7, 2048, %s371_s29, [#allocation9], %s2213_s14, %s2213_s14, %s2214_s13  }
  0x4f   : > { %2235 = sst [smem:[#allocation21_spill]] %s1976_s15  ;;  %p1450_p13 = scmp.lt.s32.totalorder %s1790_s20, 3 }
  0x50   : > { %s2236_s28 = scalar_select %p1980_p12, 1, 0 }
  0x51   : > { %s1986_s16 = sand.u32 1, %s1786_s19   ;;  %s1310_s27 = sshll.u32 %s1790_s20, 7 }
  0x52   : > { %s1245_s29 = sshll.u32 %s1986_s16, 3  ;;  %s2237_s0 = sld [smem:[#allocation22_spill]] }
  0x53   : > { %s391_s12 = scalar_lea.vmem [#allocation2], %s1245_s29  ;;  %p1997_p2 = pnand %p1450_p13, %p49_p9 }
  0x54   : > { %s398_s13 = sshll.u32 %s391_s12, 4  ;;  %s1995_s13 = int_to_ptr.vmem [resolvable:$true] %s398_s13 }
  0x55   : > { %p1660_p0 = pneg %p1997_p2 }
  0x58   : > { %s1993_s14 = scalar_lea.hbm %s2237_s0, %s1310_s27  ;;  %s1663_s22 = scalar_lea.hbm %s2237_s0, 384 }
  0x59   : > { %s1658_s7 = scalar_lea.hbm %s1993_s14, 128  ;;  %p1664_p11 = scmp.lt.s32.totalorder %s1993_s14, %s2237_s0 }
  0x5a   : > { %p1659_p10 = scmp.ne.s32.totalorder %s1993_s14, %s1658_s7  ;;  %p1665_p7 = scmp.lt.s32.totalorder %s1663_s22, %s1658_s7 }
  0x5c   : > { %p1661_p3 = pnand %p1660_p0, %p1659_p10  ;;  %p1666_p1 = por %p1665_p7, %p1664_p11 }
  0x5e   : > { %p1662_p5 = pneg %p1661_p3 }
  0x60   : > { %p1667_p9 = pnand %p1666_p1, %p1662_p5 }
  0x62   : > { %1670 = shalt.err (!%p1667_p9)
}
  0x63   : > { %s1671_s3 = scalar_lea.vmem %s1995_s13, 128  ;;  %s1800_s29 = smov [#allocation2]  }
  0x64   : > { %p1672_p13 = scmp.ne.s32.totalorder %s1995_s13, %s1671_s3  ;;  %s1676_s27 = sshll.u32 %s1800_s29, 4  ;;  %s1677_s27 = int_to_ptr.vmem [resolvable:$false] %s1676_s27 }
  0x65   : > { %s1678_s5 = scalar_lea.vmem %s1677_s27, 256  ;;  %p1679_p6 = scmp.lt.s32.totalorder %s1995_s13, %s1677_s27 }
  0x66   : > { %p1674_p10 = pnand %p1672_p13, %p1660_p0  ;;  %p1680_p12 = scmp.lt.s32.totalorder %s1678_s5, %s1671_s3 }
  0x68   : > { %p1675_p3 = pneg %p1674_p10  ;;  %p1681_p4 = por %p1680_p12, %p1679_p6 }
  0x6a   : > { %p1682_p11 = pnand %p1681_p4, %p1675_p3 }
  0x6c   : > { %1685 = shalt.err (!%p1682_p11)
}
  0x6d   : > { %s2239_s7 = smov 4   ;;  %s2240_s22 = smov 64  }
  0x6e   : > { %s2241_s30 = scalar_lea.sflag [#allocation3], %s1986_s16  ;;  %s1311_s12 = sshll.u32 %s1790_s20, 8 }
  0x6f   : > { %1438 = dma.hbm_to_vmem [thread:$0]  (!%p1997_p2), %s1993_s14, 128, %s1995_s13, %s2241_s30, %s2240_s22, %s2240_s22, %s2239_s7  }
  0x70   : > { %s2242_s29 = sshll.u32 %s1986_s16, 4  ;;  %s2038_s15 = scalar_lea.hbm %s2207_s9, %s1311_s12 }
  0x71   : > { %s412_s3 = scalar_lea.vmem [#allocation11], %s2242_s29  ;;  %s409_s19 = scalar_lea.sflag [#allocation12], %s1986_s16 }
  0x72   : > { %s419_s5 = sshll.u32 %s412_s3, 4  ;;  %s1686_s26 = scalar_lea.hbm %s2038_s15, 256  ;;  %s2040_s5 = int_to_ptr.vmem [resolvable:$true] %s419_s5 }
  0x73   : > { %p1687_p4 = scmp.ne.s32.totalorder %s2038_s15, %s1686_s26  ;;  %s1691_s7 = scalar_lea.hbm %s2207_s9, 768 }
  0x74   : > { %p1692_p5 = scmp.lt.s32.totalorder %s2038_s15, %s2207_s9  ;;  %p1693_p7 = scmp.lt.s32.totalorder %s1691_s7, %s1686_s26 }
  0x75   : > { %p1689_p6 = pnand %p1687_p4, %p1660_p0 }
  0x76   : > { %p1694_p1 = por %p1693_p7, %p1692_p5 }
  0x77   : > { %p1690_p12 = pneg %p1689_p6 }
  0x79   : > { %p1695_p9 = pnand %p1694_p1, %p1690_p12 }
  0x7b   : > { %1698 = shalt.err (!%p1695_p9)
}
  0x7c   : > { %s1699_s16 = scalar_lea.vmem %s2040_s5, 256  ;;  %s1801_s30 = smov [#allocation11]  }
  0x7d   : > { %p1700_p13 = scmp.ne.s32.totalorder %s2040_s5, %s1699_s16  ;;  %s1704_s12 = sshll.u32 %s1801_s30, 4  ;;  %s1705_s12 = int_to_ptr.vmem [resolvable:$false] %s1704_s12 }
  0x7e   : > { %s1706_s29 = scalar_lea.vmem %s1705_s12, 512  ;;  %p1707_p11 = scmp.lt.s32.totalorder %s2040_s5, %s1705_s12 }
  0x7f   : > { %p1702_p10 = pnand %p1700_p13, %p1660_p0  ;;  %p1708_p4 = scmp.lt.s32.totalorder %s1706_s29, %s1699_s16 }
  0x81   : > { %p1703_p3 = pneg %p1702_p10  ;;  %p1709_p6 = por %p1708_p4, %p1707_p11 }
  0x83   : > { %p1710_p5 = pnand %p1709_p6, %p1703_p3 }
  0x85   : > { %1713 = shalt.err (!%p1710_p5)
}
  0x86   : > { %s2243_s26 = smov 8   ;;  %s2244_s3 = smov 128  }
  0x87   : > { %1441 = dma.hbm_to_vmem [thread:$0]  (!%p1997_p2), %s2038_s15, 256, %s2040_s5, %s409_s19, %s2244_s3, %s2244_s3, %s2243_s26  }
  0x88   : > { %431 = sbr.rel (%p1908_p8) target bundleno = 1156 (0x484), region = 60  ;;  %s2071_s27 = sand.u32 (!%p1908_p8), 1, %s1782_s18  }
  0x89   : > { %s1252_s14 = sshll.u32 (!%p1908_p8), %s2071_s27, 3  ;;  %s434_s13 = scalar_lea.sflag (!%p1908_p8), [#allocation3], %s2071_s27 }
  0x8a   : > { %s2075_s7 = scalar_lea.vmem (!%p1908_p8), [#allocation2], %s1252_s14  ;;  %p2245_p0 = scmp.ne.s32.totalorder (!%p1908_p8), %s2226_s23, 0 }
  0x8d   : > { %1757 = dma.done.wait (%p2245_p0), %s434_s13, 128  }
  0x8e   : > { %1759 = vsyncadd (%p2245_p0), %s434_s13, 4294967168  ;;  %p2246_p2 = scmp.eq.s32.totalorder %s1889_s21, 0 }
  0x90   : > { %1761 = dma.done.wait (%p2246_p2), [#allocation6], 2048   ;;  %p2247_p8 = pmov %p2246_p2 }
  0x91   : > { %p2248_p12 = pmov %p2246_p2 }
  0x92   : > { %1763 = vsyncadd (%p2247_p8), [#allocation6], 4294965248 }
  0x93   : > { %1765 = dma.done.wait (%p2248_p12), [#allocation9], 3072   ;;  %p2249_p7 = pmov %p2246_p2 }
  0x94   : > { %s1257_s1 = sshll.u32 %s2071_s27, 4  ;;  %s459_s19 = scalar_lea.sflag [#allocation12], %s2071_s27 }
  0x95   : > { %1767 = vsyncadd (%p2249_p7), [#allocation9], 4294964224  ;;  %s2093_s25 = scalar_lea.vmem [#allocation11], %s1257_s1 }
  0x96   : > { %1769 = dma.done.wait (%p2245_p0), %s459_s19, 256  }
  0x97   : > { %1771 = vsyncadd (%p2245_p0), %s459_s19, 4294967040  ;;  %v1802_v0 = vmov 0.0   ;;  %vm1803_vm0 = vmmov 0   ;;  %v1501_v1 = vld [vmem:[#allocation5 + $0x38] sm:$0xff]   ;;  %v1502_v2 = vld [vmem:[#allocation5 + $0x30] sm:$0xff]   ;;  %v1804_v62 = vmov 0  }
  0x98   : > { %1340 = vmatprep.subr.bf16.mxu0 %v1802_v0  ;;  %1356 = vmatprep.mubr.msk.bf16.mxu0 %vm1803_vm0, %v1802_v0  ;;  %v1503_v3 = vld [vmem:[#allocation5 + $0x28] sm:$0xff]   ;;  %v1510_v4 = vld [vmem:[#allocation7 + $0x38] sm:$0xff]   ;;  %v1504_v5 = vld [vmem:[#allocation5 + $0x20] sm:$0xff]   ;;  %s503_s29 = scalar_lea.vmem [#allocation13], %s1257_s1  ;;  %s1312_s26 = sshll.u32 %s1889_s21, 8 }
  0x99   : > { %1360 = vmatprep.subr.bf16.mxu1 %v1802_v0  ;;  %1376 = vmatprep.mubr.msk.bf16.mxu1 %vm1803_vm0, %v1802_v0  ;;  %v1511_v6 = vld [vmem:[#allocation7 + $0x30] sm:$0xff]   ;;  %v1505_v7 = vld [vmem:[#allocation5 + $0x18] sm:$0xff]   ;;  %v1512_v8 = vld [vmem:[#allocation7 + $0x28] sm:$0xff]   ;;  %s1075_s3 = sshll.u32 %s503_s29, 4  ;;  %s1057_s19 = scalar_lea.sflag [#allocation4], %s2071_s27  ;;  %s2152_s3 = int_to_ptr.vmem [resolvable:$true] %s1075_s3 }
  0x9a   : > { %1341 = vmatpush3.bf16.msra.mxu0 %v1501_v1  ;;  %1361 = vmatpush3.bf16.msra.mxu1 %v1510_v4  ;;  %v1506_v9 = vld [vmem:[#allocation5 + $0x10] sm:$0xff]   ;;  %v1513_v10 = vld [vmem:[#allocation7 + $0x20] sm:$0xff]   ;;  %v1507_v11 = vld [vmem:[#allocation5 + $0x8] sm:$0xff]   ;;  %p2250_p9 = scmp.ne.s32.totalorder %s2236_s28, 0  ;;  %s1805_s1 = smov [#allocation13]  }
  0x9b   : > { %1342 = vmatprep.subr.bf16.mxu0 %v1802_v0  ;;  %1362 = vmatprep.subr.bf16.mxu1 %v1802_v0  ;;  %v1514_v12 = vld [vmem:[#allocation7 + $0x18] sm:$0xff]   ;;  %v1508_v13 = vld [vmem:[#allocation5] sm:$0xff]   ;;  %v1515_v15 = vld [vmem:[#allocation7 + $0x10] sm:$0xff]   ;;  %s1718_s23 = sshll.u32 %s1805_s1, 4  ;;  %s1719_s23 = int_to_ptr.vmem [resolvable:$false] %s1718_s23 }
  0x9c   : > { %v1509_v14 = vld [vmem:[%s2075_s7] sm:$0xff]   ;;  %v1516_v16 = vld [vmem:[#allocation7 + $0x8] sm:$0xff]   ;;  %v1517_v17 = vld [vmem:[#allocation7] sm:$0xff]   ;;  %s2150_s7 = scalar_lea.hbm %s2208_s10, %s1312_s26  ;;  %s1720_s15 = scalar_lea.vmem %s1719_s23, 512 }
  0x9d   : > { %v1518_v18 = vld [vmem:[#allocation8 + $0x38] sm:$0xff]   ;;  %v1519_v19 = vld [vmem:[#allocation8 + $0x30] sm:$0xff]   ;;  %v1520_v20 = vld [vmem:[#allocation8 + $0x28] sm:$0xff]   ;;  %p1721_p3 = scmp.lt.s32.totalorder %s2152_s3, %s1719_s23 }
  0x9e   : > { %1343 = vmatpush3.bf16.msra.mxu0 %v1502_v2  ;;  %1363 = vmatpush3.bf16.msra.mxu1 %v1511_v6  ;;  %v1521_v21 = vld [vmem:[#allocation8 + $0x20] sm:$0xff]   ;;  %v1522_v22 = vld [vmem:[#allocation8 + $0x18] sm:$0xff]   ;;  %v1261_v23 = vld [vmem:[%s2200_s2] ss:$0 sm:$0xff] }
  0x9f   : > { %1344 = vmatprep.subr.bf16.mxu0 %v1802_v0  ;;  %1364 = vmatprep.subr.bf16.mxu1 %v1802_v0  ;;  %v1523_v33 = vld [vmem:[#allocation8 + $0x10] sm:$0xff]   ;;  %v1524_v34 = vld [vmem:[#allocation8 + $0x8] sm:$0xff]   ;;  %v1525_v35 = vld [vmem:[#allocation8] sm:$0xff]  }
  0xa0   : > { %v1526_v36 = vld [vmem:[#allocation10 + $0x70] ss:$8 sps:$4 sm:$0xff]   ;;  %v1528_v37 = vld [vmem:[#allocation10 + $0x74] ss:$8 sps:$4 sm:$0xff]   ;;  %v1531_v38 = vld [vmem:[#allocation10 + $0x64] ss:$8 sps:$4 sm:$0xff]  }
  0xa1   : > { %v1529_v39 = vld [vmem:[#allocation10 + $0x60] ss:$8 sps:$4 sm:$0xff]   ;;  %v1534_v40 = vld [vmem:[#allocation10 + $0x54] ss:$8 sps:$4 sm:$0xff]   ;;  %v1532_v41 = vld [vmem:[#allocation10 + $0x50] ss:$8 sps:$4 sm:$0xff]  }
  0xa2   : > { %1345 = vmatpush3.bf16.msra.mxu0 %v1503_v3  ;;  %1365 = vmatpush3.bf16.msra.mxu1 %v1512_v8  ;;  %v1537_v42 = vld [vmem:[#allocation10 + $0x44] ss:$8 sps:$4 sm:$0xff]   ;;  %v1535_v43 = vld [vmem:[#allocation10 + $0x40] ss:$8 sps:$4 sm:$0xff]   ;;  %v1540_v44 = vld [vmem:[#allocation10 + $0x34] ss:$8 sps:$4 sm:$0xff]  }
  0xa3   : > { %1346 = vmatprep.subr.bf16.mxu0 %v1802_v0  ;;  %1366 = vmatprep.subr.bf16.mxu1 %v1802_v0  ;;  %v1538_v45 = vld [vmem:[#allocation10 + $0x30] ss:$8 sps:$4 sm:$0xff]   ;;  %v1543_v46 = vld [vmem:[#allocation10 + $0x24] ss:$8 sps:$4 sm:$0xff]   ;;  %v1541_v47 = vld [vmem:[#allocation10 + $0x20] ss:$8 sps:$4 sm:$0xff]  }
  0xa4   : > { %v1271_v48 = vld [vmem:[%s2202_s4] ss:$0 sm:$0xff]  ;;  %v1546_v58 = vld [vmem:[#allocation10 + $0x14] ss:$8 sps:$4 sm:$0xff]   ;;  %v1549_v60 = vld [vmem:[#allocation10 + $0x4] ss:$8 sps:$4 sm:$0xff]  }
  0xa5   : > { %v1544_v59 = vld [vmem:[#allocation10 + $0x10] ss:$8 sps:$4 sm:$0xff]   ;;  %v1547_v61 = vld [vmem:[#allocation10] ss:$8 sps:$4 sm:$0xff]  }
  0xa6   : > { %1347 = vmatpush3.bf16.msra.mxu0 %v1504_v5  ;;  %1367 = vmatpush3.bf16.msra.mxu1 %v1513_v10  ;;  %v888_v10 = vld [vmem:[%s2206_s8] sm:$0x3] }
  0xa7   : > { %1348 = vmatprep.subr.bf16.mxu0 %v1802_v0  ;;  %1368 = vmatprep.subr.bf16.mxu1 %v1802_v0 }
  0xaa   : > { %1349 = vmatpush3.bf16.msra.mxu0 %v1505_v7  ;;  %1369 = vmatpush3.bf16.msra.mxu1 %v1514_v12  ;;  %v890_v7 = vlaneseq }
  0xab   : > { %1350 = vmatprep.subr.bf16.mxu0 %v1802_v0  ;;  %1370 = vmatprep.subr.bf16.mxu1 %v1802_v0 }
  0xac   : > { %v891_v8 = vshrl.u32 %v890_v7, 7 }
  0xae   : > { %1351 = vmatpush3.bf16.msra.mxu0 %v1506_v9  ;;  %1371 = vmatpush3.bf16.msra.mxu1 %v1515_v15  ;;  %v896_v9 = vsub.s32 1, %v891_v8 }
  0xaf   : > { %1352 = vmatprep.subr.bf16.mxu0 %v1802_v0  ;;  %1372 = vmatprep.subr.bf16.mxu1 %v1802_v0 }
  0xb2   : > { %1353 = vmatpush3.bf16.msra.mxu0 %v1507_v11  ;;  %1373 = vmatpush3.bf16.msra.mxu1 %v1516_v16  ;;  %v897_v11 = vrot.slane %v888_v10, %v896_v9 }
  0xb3   : > { %1354 = vmatprep.subr.bf16.mxu0 %v1802_v0  ;;  %1374 = vmatprep.subr.bf16.mxu1 %v1802_v0 }
  0xb6   : > { %1355 = vmatpush3.bf16.msra.mxu0 %v1508_v13  ;;  %1375 = vmatpush3.bf16.msra.mxu1 %v1517_v17 }
  0xb7   : > { %1380 = vmatprep.subr.bf16.mxu0 %v1802_v0  ;;  %980 = vmatprep.subr.bf16.mxu1 %v1528_v37 }
  0xb9   : > { %1357 = vmatmul.mubr.bf16.vlgmr.msra.gmra.mxu0 %v1509_v14 }
  0xba   : > { %1396 = vmatprep.mubr.msk.bf16.mxu0 %vm1803_vm0, %v1802_v0  ;;  %1381 = vmatpush3.bf16.msra.mxu0 %v1518_v18 }
  0xbb   : > { %1382 = vmatprep.subr.bf16.mxu0 %v1802_v0 }
  0xbe   : > { %1383 = vmatpush3.bf16.msra.mxu0 %v1519_v19 }
  0xbf   : > { %1384 = vmatprep.subr.bf16.mxu0 %v1802_v0 }
  0xc2   : > { %1385 = vmatpush3.bf16.msra.mxu0 %v1520_v20  ;;  %v892_v20 = vsub.s32 0, %v891_v8 }
  0xc3   : > { %1386 = vmatprep.subr.bf16.mxu0 %v1802_v0 }
  0xc6   : > { %1387 = vmatpush3.bf16.msra.mxu0 %v1521_v21 }
  0xc7   : > { %1388 = vmatprep.subr.bf16.mxu0 %v1802_v0 }
  0xca   : > { %1389 = vmatpush3.bf16.msra.mxu0 %v1522_v22 }
  0xcb   : > { %1390 = vmatprep.subr.bf16.mxu0 %v1802_v0 }
  0xce   : > { %1391 = vmatpush3.bf16.msra.mxu0 %v1523_v33 }
  0xcf   : > { %1392 = vmatprep.subr.bf16.mxu0 %v1802_v0 }
  0xd2   : > { %1393 = vmatpush3.bf16.msra.mxu0 %v1524_v34  ;;  %v1030_v34 = vld [vmem:[%s2093_s25 + $0x8] sm:$0xff] }
  0xd3   : > { %1394 = vmatprep.subr.bf16.mxu0 %v1802_v0  ;;  %v1280_v0 = vld [vmem:[%s2204_s6] ss:$0 sm:$0xff] }
  0xd6   : > { %1395 = vmatpush3.bf16.msra.mxu0 %v1525_v35 }
 0x179   : > { %v634_v24 = vpop.f32.mrf.mxu0 }
 0x17a   : > { %v635_v26 = vadd.f32 %v1261_v23, %v634_v24 }
 0x17b   : > { %v1358_v25 = vpop.f32.mrf.mxu0 }
 0x17c   : > { %v641_v30 = vmax.f32 %v635_v26, 0.0  ;;  %v1029_v26 = vld [vmem:[%s2093_s25] sm:$0xff]  ;;  %s1714_s25 = scalar_lea.vmem %s2152_s3, 256 }
 0x17d   : > { %v637_v27 = vpop.f32.mrf.mxu0  ;;  %p1715_p1 = scmp.ne.s32.totalorder %s2152_s3, %s1714_s25  ;;  %p1722_p11 = scmp.lt.s32.totalorder %s1720_s15, %s1714_s25 }
 0x17e   : > { %v638_v28 = vadd.f32 %v1261_v23, %v637_v27  ;;  %v893_v23 = vrot.slane %v888_v10, %v892_v20 }
 0x17f   : > { %v1359_v29 = vpop.f32.mrf.mxu0  ;;  %p1716_p13 = pnand %p1715_p1, %p2250_p9  ;;  %p1723_p4 = por %p1722_p11, %p1721_p3 }
 0x180   : > { %v642_v31 = vmax.f32 %v638_v28, 0.0 }
 0x181   : > { %p1717_p10 = pneg %p1716_p13 }
 0x182   : > { %v643_v32 = vpack.c.bf16 %v642_v31, %v641_v30 }
 0x183   : > { %p1724_p6 = pnand %p1723_p4, %p1717_p10 }
 0x184   : > { %1377 = vmatmul.mubr.bf16.vlgmr.msra.gmra.mxu1 %v643_v32 }
 0x185   : > { %981 = vmatpush1.bf16.msra.mxu1 %v1526_v36  ;;  %1012 = vmatprep.mubr.bf16.mxu1 %v1804_v62 }
 0x186   : > { %982 = vmatprep.subr.bf16.mxu1 %v1531_v38 }
 0x189   : > { %983 = vmatpush1.bf16.msra.mxu1 %v1529_v39 }
 0x18a   : > { %984 = vmatprep.subr.bf16.mxu1 %v1534_v40 }
 0x18d   : > { %985 = vmatpush1.bf16.msra.mxu1 %v1532_v41 }
 0x18e   : > { %986 = vmatprep.subr.bf16.mxu1 %v1537_v42 }
 0x191   : > { %987 = vmatpush1.bf16.msra.mxu1 %v1535_v43 }
 0x192   : > { %988 = vmatprep.subr.bf16.mxu1 %v1540_v44 }
 0x195   : > { %989 = vmatpush1.bf16.msra.mxu1 %v1538_v45 }
 0x196   : > { %990 = vmatprep.subr.bf16.mxu1 %v1543_v46 }
 0x199   : > { %991 = vmatpush1.bf16.msra.mxu1 %v1541_v47 }
 0x19a   : > { %992 = vmatprep.subr.bf16.mxu1 %v1546_v58 }
 0x19d   : > { %993 = vmatpush1.bf16.msra.mxu1 %v1544_v59 }
 0x19e   : > { %994 = vmatprep.subr.bf16.mxu1 %v1549_v60 }
 0x1a1   : > { %995 = vmatpush1.bf16.msra.mxu1 %v1547_v61 }
 0x244   : > { %v749_v49 = vpop.f32.mrf.mxu1 }
 0x245   : > { %v750_v51 = vadd.f32 %v1271_v48, %v749_v49 }
 0x246   : > { %v1378_v50 = vpop.f32.mrf.mxu1 }
 0x247   : > { %v756_v55 = vmax.f32 %v750_v51, 0.0 }
 0x248   : > { %v752_v52 = vpop.f32.mrf.mxu1 }
 0x249   : > { %v753_v53 = vadd.f32 %v1271_v48, %v752_v52 }
 0x24a   : > { %v1379_v54 = vpop.f32.mrf.mxu1 }
 0x24b   : > { %v757_v56 = vmax.f32 %v753_v53, 0.0 }
 0x24d   : > { %v758_v57 = vpack.c.bf16 %v757_v56, %v756_v55 }
 0x24f   : > { %1397 = vmatmul.mubr.bf16.vlgmr.msra.gmra.mxu0 %v758_v57 }
 0x30f   : > { %v864_v63 = vpop.f32.mrf.mxu0 }
 0x310   : > { %v865_v3 = vadd.f32 %v1280_v0, %v864_v63 }
 0x311   : > { %v1398_v1 = vpop.f32.mrf.mxu0 }
 0x313   : > { %v867_v2 = vpop.f32.mrf.mxu0 }
 0x314   : > { %v868_v4 = vadd.f32 %v1280_v0, %v867_v2 }
 0x315   : > { %v1399_v5 = vpop.f32.mrf.mxu0 }
 0x316   : > { %v871_v6 = vpack.c.bf16 %v868_v4, %v865_v3 }
 0x318   : > { %1013 = vmatmul.mubr.bf16.vlgmr.msra.gmra.mxu1 %v871_v6 }
 0x3d8   : > { %v1014_v12 = vpop.f32.mrf.mxu1 }
 0x3d9   : > { %v1015_v24 = vadd.f32 %v1014_v12, %v893_v23 }
 0x3da   : > { %v1016_v13 = vpop.f32.mrf.mxu1 }
 0x3db   : > { %v1017_v14 = vadd.f32 %v1016_v13, %v897_v11  ;;  %v1039_v27 = vmul.f32 %v1015_v24, %v1015_v24 }
 0x3dc   : > { %v1018_v15 = vpop.f32.mrf.mxu1 }
 0x3dd   : > { %v1023_v16 = vmul.f32 0.5, %v1017_v14  ;;  %v1037_v25 = vadd.f32 1.0, %v1017_v14  ;;  %v1019_v28 = vadd.f32 %v1018_v15, %v893_v23 }
 0x3de   : > { %v1020_v17 = vpop.f32.mrf.mxu1 }
 0x3df   : > { %v1025_v18 = vmul.f32 1.442695, %v1023_v16  ;;  %v1021_v19 = vadd.f32 %v1020_v17, %v897_v11  ;;  %v1041_v32 = vsub.f32 %v1037_v25, %v1039_v27  ;;  %v1040_v36 = vmul.f32 %v1019_v28, %v1019_v28 }
 0x3e1   : > { %1550 = vpow2.f32 %v1025_v18  ;;  %v1024_v21 = vmul.f32 0.5, %v1021_v19  ;;  %v1038_v31 = vadd.f32 1.0, %v1021_v19 }
 0x3e3   : > { %v1027_v22 = vmul.f32 1.442695, %v1024_v21  ;;  %v1042_v40 = vsub.f32 %v1038_v31, %v1040_v36 }
 0x3e5   : > { %1552 = vpow2.f32 %v1027_v22 }
 0x3ee   : > { %v1551_v29 = vpop.eup %1550 }
 0x3ef   : > { %v1031_v30 = vmul.f32 %v1551_v29, %v1029_v26  ;;  %v1043_v33 = vmul.f32 %v1551_v29, %v1551_v29 }
 0x3f1   : > { %v1033_v35 = vadd.f32 %v1031_v30, %v1015_v24  ;;  %v1045_v37 = vsub.f32 %v1041_v32, %v1043_v33 }
 0x3f2   : > { %v1553_v38 = vpop.eup %1552 }
 0x3f3   : > { %v1032_v39 = vmul.f32 %v1553_v38, %v1030_v34  ;;  %1047 = vadd.xlane.f32.xlu0 %v1045_v37  ;;  %v1044_v41 = vmul.f32 %v1553_v38, %v1553_v38  ;;  %1035 = vst [vmem:[%s503_s29] sm:$0xff] %v1033_v35 }
 0x3f5   : > { %v1034_v42 = vadd.f32 %v1032_v39, %v1019_v28  ;;  %v1046_v43 = vsub.f32 %v1042_v40, %v1044_v41 }
 0x3f7   : > { %1049 = vadd.xlane.f32.xlu0 %v1046_v43  ;;  %1036 = vst [vmem:[%s503_s29 + $0x8] sm:$0xff] %v1034_v42 }
 0x3f8   : > { %1727 = shalt.err (!%p1724_p6)
}
 0x3f9   : > { %s1728_s5 = scalar_lea.hbm %s2150_s7, 256  ;;  %s1732_s16 = scalar_lea.hbm %s2208_s10, 768 }
 0x3fa   : > { %p1729_p5 = scmp.ne.s32.totalorder %s2150_s7, %s1728_s5  ;;  %p1733_p8 = scmp.lt.s32.totalorder %s2150_s7, %s2208_s10 }
 0x3fb   : > { %p1734_p12 = scmp.lt.s32.totalorder %s1732_s16, %s1728_s5 }
 0x3fc   : > { %p1730_p0 = pnand %p1729_p5, %p2250_p9 }
 0x3fd   : > { %p1735_p7 = por %p1734_p12, %p1733_p8 }
 0x3fe   : > { %p1731_p2 = pneg %p1730_p0 }
 0x400   : > { %p1736_p1 = pnand %p1735_p7, %p1731_p2 }
 0x402   : > { %1739 = shalt.err (!%p1736_p1)
}
 0x403   : > { %s1806_s29 = smov 128   ;;  %s1807_s26 = smov 8   ;;  %vm1053_vm1 = vcmask 7168  }
 0x404   : > { %1420 = dma.vmem_to_hbm [thread:$0]  (%p2250_p9), %s2152_s3, 256, %s2150_s7, %s1057_s19, %s1806_s29, %s1806_s29, %s1807_s26  }
 0x405   : > { %s1259_s14 = sshll.u32 %s1889_s21, 1 }
 0x406   : > { %p515_p13 = scmp.lt.s32.totalorder %s1259_s14, 5 }
 0x408   : > { %s2258_s14 = smov (!%p515_p13, %s1259_s14), 5 }
 0x409   : > { %s1260_s13 = sshll.u32 %s2258_s14, 3 }
 0x40a   : > { %s518_s23 = scalar_lea.vmem %s2209_s11, %s1260_s13 }
 0x47c   : > { %v1048_v44 = vpop.xlane.xlu0 %1047 }
 0x47d   : > { %v1051_v45 = vmul.f32 -0.5, %v1048_v44 }
 0x47f   : > { %1054 = vst.msk [vmem:[%s518_s23] sm:$0xff] %vm1053_vm1, %v1051_v45 }
 0x480   : > { %v1050_v46 = vpop.xlane.xlu0 %1049 }
 0x481   : > { %v1052_v47 = vmul.f32 -0.5, %v1050_v46 }
 0x483   : > { %1055 = vst.msk [vmem:[%s518_s23 + $0x8] sm:$0xff] %vm1053_vm1, %v1052_v47 }
 0x484 PF: > { %p1455_p9 = scmp.ge.s32.totalorder %s1790_s20, 2  ;;  %s1094_s21 = sand.u32 1, %s1778_s17  }
 0x485   : > { %p2251_p10 = scmp.ne.s32.totalorder %s2227_s24, 0  ;;  %s1095_s28 = scalar_lea.sflag [#allocation4], %s1094_s21 }
 0x487   : > { %p1443_p3 = pnand %p1455_p9, %p2251_p10 }
 0x489   : > { %p1444_p11 = pneg %p1443_p3 }
 0x48b   : > { %1773 = dma.done.wait (%p1444_p11), %s1095_s28, 256  }
 0x48c   : > { %1775 = vsyncadd (%p1444_p11), %s1095_s28, 4294967040  ;;  %s2252_s20 = sld [smem:[#allocation20_spill]]  ;;  %s2255_s17 = smov %s1782_s18 }
 0x48d   : > { %s2253_s27 = sld [smem:[#allocation19_spill]] }
 0x48e   : > { %s2254_s19 = sld [smem:[#allocation21_spill]] }
 0x492   : > { %p30_p4 = scmp.ge.s32.totalorder %s2252_s20, 5  }
 0x493   : > { %s2256_s18 = smov %s2253_s27 }
 0x494   :  { %32 = sbr.rel (!%p30_p4) target bundleno = 15 (0xf), region = 146 }
 0x499   :  { %1108 = vsyncpa [#allocation3], 1 }
 0x49a   :  { %1110 = vsyncpa [#allocation3 + $0x1], 1 }
 0x49b   :  { %1111 = vsyncpa [#allocation6], 1 }
 0x49c   :  { %1112 = vsyncpa [#allocation9], 1 }
 0x49d   :  { %1113 = vsyncpa [#allocation12], 1 }
 0x49e   :  { %1115 = vsyncpa [#allocation12 + $0x1], 1 }
 0x49f   :  { %1116 = vsyncpa [#allocation4], 1 }
 0x4a0   :  { %1118 = vsyncpa [#allocation4 + $0x1], 1 }

// kernel: tpu_custom_call.1
= control target key start
LH: loop header
LB: loop body
LE: loop exit
PB: predicated region body
PF: predicated region fallthrough
CT: control target
= control target key end

     0   :  { %s2198_s0 = inlined_call_operand.hbm [shape: bf16[48,128], index: 0, kind: input, shape index: {}]   ;;  %s2199_s1 = inlined_call_operand.hbm [shape: bf16[128,128], index: 1, kind: input, shape index: {}]   ;;  %s2200_s2 = inlined_call_operand.vmem [shape: f32[1,128], index: 2, kind: input, shape index: {}]   ;;  %s2201_s3 = inlined_call_operand.hbm [shape: bf16[128,128], index: 3, kind: input, shape index: {}]   ;;  %s2202_s4 = inlined_call_operand.vmem [shape: f32[1,128], index: 4, kind: input, shape index: {}]   ;;  %s2203_s5 = inlined_call_operand.hbm [shape: bf16[128,128], index: 5, kind: input, shape index: {}]   ;;  %s2204_s6 = inlined_call_operand.vmem [shape: f32[1,128], index: 6, kind: input, shape index: {}]   ;;  %s2205_s7 = inlined_call_operand.hbm [shape: bf16[128,256], index: 7, kind: input, shape index: {}]   ;;  %s2206_s8 = inlined_call_operand.vmem [shape: f32[1,256], index: 8, kind: input, shape index: {}]   ;;  %s2207_s9 = inlined_call_operand.hbm [shape: f32[48,128], index: 9, kind: input, shape index: {}]   ;;  %s2208_s10 = inlined_call_operand.hbm [shape: f32[48,128], index: 10, kind: output, shape index: {0}]   ;;  %s2209_s11 = inlined_call_operand.vmem [shape: f32[48,1], index: 11, kind: output, shape index: {1}]  }
   0x1   :  { %2220 = sst [smem:[#allocation22_spill]] %s2198_s0 }
   0x2   :  { %2221 = sst [smem:[#allocation23_spill]] %s2199_s1 }
   0x3   :  { %2222 = sst [smem:[#allocation24_spill]] %s2201_s3 }
   0x4   :  { %2223 = sst [smem:[#allocation25_spill]] %s2203_s5 }
   0x5   :  { %2224 = sst [smem:[#allocation26_spill]] %s2205_s7 }
   0x6   :  { %17 = vsyncpa [#allocation3], 0 }
   0x7   :  { %19 = vsyncpa [#allocation3 + $0x1], 0 }
   0x8   :  { %20 = vsyncpa [#allocation6], 0 }
   0x9   :  { %21 = vsyncpa [#allocation9], 0 }
   0xa   :  { %22 = vsyncpa [#allocation12], 0 }
   0xb   :  { %24 = vsyncpa [#allocation12 + $0x1], 0 }
   0xc   :  { %25 = vsyncpa [#allocation4], 0 }
   0xd   :  { %27 = vsyncpa [#allocation4 + $0x1], 0  ;;  %s1868_s17 = smov 0   ;;  %s1870_s18 = smov 0  }
   0xe   :  { %s1872_s19 = smov 0   ;;  %s1874_s20 = smov 0  }
   0xf LB: > { %2225 = sst [smem:[#allocation19_spill]] %s1786_s19  ;;  %s1889_s21 = sadd.s32 4294967295, %s1790_s20   ;;  %s1790_s20 = sphi %s1874_s20, %s2252_s20   ;;  %s1786_s19 = sphi %s1872_s19, %s2254_s19   ;;  %s1782_s18 = sphi %s1870_s18, %s2256_s18   ;;  %s1778_s17 = sphi %s1868_s17, %s2255_s17  }
  0x10   : > { %s1238_s22 = sadd.s32 4294967294, %s1790_s20   ;;  %p53_p0 = scmp.ne.s32.totalorder %s1782_s18, %s1778_s17 }
  0x11   : > { %p2210_p1 = scmp.eq.s32.totalorder %s1889_s21, 0  ;;  %p271_p2 = scmp.eq.s32.totalorder %s1889_s21, 2 }
  0x12   : > { %p277_p3 = scmp.eq.s32.totalorder %s1238_s22, 2  ;;  %p1239_p5 = scmp.ge.s32.totalorder %s1790_s20, 1 }
  0x13   : > { %p1898_p4 = por %p2210_p1, %p53_p0  ;;  %p310_p7 = scmp.lt.s32.totalorder %s1790_s20, 4 }
  0x14   : > { %p1903_p6 = por %p277_p3, %p53_p0  ;;  %s1792_s26 = smov [#allocation5]  }
  0x15   : > { %s2226_s23 = scalar_select %p1898_p4, 1, 0 }
  0x16   : > { %s2227_s24 = scalar_select %p1903_p6, 1, 0 }
  0x17   : > { %p1908_p8 = pnand %p1239_p5, %p310_p7  ;;  %s322_s27 = sshll.u32 %s1792_s26, 4  ;;  %s323_s27 = int_to_ptr.vmem [resolvable:$true] %s322_s27 }
  0x18   : > { %s1793_s29 = smov [#allocation8]   ;;  %s1794_s12 = smov [#allocation7]  }
  0x19   : > { %p1422_p9 = pneg %p1908_p8  ;;  %s354_s30 = sshll.u32 %s1793_s29, 4  ;;  %s355_s30 = int_to_ptr.vmem [resolvable:$true] %s354_s30 }
  0x1a   : > { %s338_s13 = sshll.u32 %s1794_s12, 4  ;;  %s1565_s14 = scalar_lea.vmem %s323_s27, 1024  ;;  %s339_s13 = int_to_ptr.vmem [resolvable:$true] %s338_s13 }
  0x1b   : > { %p1916_p10 = pnand %p1422_p9, %p2210_p1  ;;  %p1566_p12 = scmp.ne.s32.totalorder %s323_s27, %s1565_s14 }
  0x1c   : > { %p1573_p3 = scmp.lt.s32.totalorder %s323_s27, %s323_s27  ;;  %p1574_p5 = scmp.lt.s32.totalorder %s1565_s14, %s1565_s14 }
  0x1d   : > { %p1556_p11 = pneg %p1916_p10 }
  0x1e   : > { %p1575_p7 = por %p1574_p5, %p1573_p3 }
  0x1f   : > { %p1568_p13 = pnand %p1566_p12, %p1556_p11 }
  0x21   : > { %p1569_p0 = pneg %p1568_p13 }
  0x23   : > { %p1576_p9 = pnand %p1575_p7, %p1569_p0 }
  0x25   : > { %1579 = shalt.err (!%p1576_p9)
}
  0x26   : > { %s2211_s15 = smov 64   ;;  %s2212_s16 = smov 4  }
  0x27   : > { %s2230_s1 = sld [smem:[#allocation23_spill]]  ;;  %s1591_s29 = scalar_lea.vmem %s355_s30, 1024 }
  0x28   : > { %p1592_p12 = scmp.ne.s32.totalorder %s355_s30, %s1591_s29  ;;  %p1599_p0 = scmp.lt.s32.totalorder %s355_s30, %s355_s30 }
  0x29   : > { %p1600_p5 = scmp.lt.s32.totalorder %s1591_s29, %s1591_s29 }
  0x2a   : > { %p1594_p13 = pnand %p1592_p12, %p1556_p11 }
  0x2b   : > { %p1601_p7 = por %p1600_p5, %p1599_p0 }
  0x2c   : > { %p1595_p3 = pneg %p1594_p13 }
  0x2d   : > { %1425 = dma.hbm_to_vmem [thread:$0]  (!%p1916_p10), %s2230_s1, 1024, %s323_s27, [#allocation6], %s2211_s15, %s2211_s15, %s2212_s16  }
  0x2e   : > { %p1602_p9 = pnand %p1601_p7, %p1595_p3 }
  0x30   : > { %1605 = shalt.err (!%p1602_p9)
}
  0x31   : > { %s2231_s5 = sld [smem:[#allocation25_spill]]  ;;  %s1617_s27 = scalar_lea.vmem %s339_s13, 1024 }
  0x32   : > { %p1618_p1 = scmp.ne.s32.totalorder %s339_s13, %s1617_s27  ;;  %p1625_p0 = scmp.lt.s32.totalorder %s339_s13, %s339_s13 }
  0x33   : > { %p1626_p3 = scmp.lt.s32.totalorder %s1617_s27, %s1617_s27 }
  0x34   : > { %p1620_p12 = pnand %p1618_p1, %p1556_p11 }
  0x35   : > { %p1627_p5 = por %p1626_p3, %p1625_p0 }
  0x36   : > { %p1621_p13 = pneg %p1620_p12 }
  0x37   : > { %1431 = dma.hbm_to_vmem [thread:$0]  (!%p1916_p10), %s2231_s5, 1024, %s355_s30, [#allocation9], %s2211_s15, %s2211_s15, %s2212_s16  }
  0x38   : > { %p1628_p7 = pnand %p1627_p5, %p1621_p13 }
  0x3a   : > { %1631 = shalt.err (!%p1628_p7)
}
  0x3b   : > { %s2232_s3 = sld [smem:[#allocation24_spill]]  ;;  %s1797_s30 = smov [#allocation10]  }
  0x3c   : > { %s370_s29 = sshll.u32 %s1797_s30, 4  ;;  %s371_s29 = int_to_ptr.vmem [resolvable:$true] %s370_s29 }
  0x3d   : > { %s1643_s12 = scalar_lea.vmem %s371_s29, 2048  ;;  %p1651_p13 = scmp.lt.s32.totalorder %s371_s29, %s371_s29 }
  0x3e   : > { %p1644_p1 = scmp.ne.s32.totalorder %s371_s29, %s1643_s12  ;;  %p1652_p0 = scmp.lt.s32.totalorder %s1643_s12, %s1643_s12 }
  0x40   : > { %p1646_p9 = pnand %p1644_p1, %p1556_p11  ;;  %p1653_p3 = por %p1652_p0, %p1651_p13 }
  0x41   : > { %1428 = dma.hbm_to_vmem [thread:$0]  (!%p1916_p10), %s2232_s3, 1024, %s339_s13, [#allocation6], %s2211_s15, %s2211_s15, %s2212_s16  }
  0x42   : > { %p1647_p12 = pneg %p1646_p9 }
  0x44   : > { %p1654_p5 = pnand %p1653_p3, %p1647_p12 }
  0x46   : > { %1657 = shalt.err (!%p1654_p5)
}
  0x47   : > { %s2213_s14 = smov 128   ;;  %s2214_s13 = smov 8  }
  0x48   : > { %s2233_s7 = sld [smem:[#allocation26_spill]]  ;;  %s1967_s26 = sadd.s32 1, %s1790_s20  }
  0x49   : > { %2234 = sst [smem:[#allocation20_spill]] %s1967_s26  ;;  %s37_s30 = ssub.s32 %s1790_s20, %s1967_s26 }
  0x4a   : > { %p38_p11 = scmp.eq.s32.totalorder %s37_s30, 0  ;;  %s40_s12 = sadd.s32 1, %s1786_s19 }
  0x4b   : > { %p47_p7 = scmp.ne.s32.totalorder %s1786_s19, %s1782_s18  ;;  %p48_p1 = scmp.eq.s32.totalorder %s1790_s20, 0 }
  0x4c   : > { %s1976_s15 = scalar_select %p38_p11, %s1786_s19, %s40_s12  }
  0x4d   : > { %p49_p9 = por %p48_p1, %p47_p7  ;;  %p1980_p12 = por %p271_p2, %p47_p7 }
  0x4e   : > { %1434 = dma.hbm_to_vmem [thread:$0]  (!%p1916_p10), %s2233_s7, 2048, %s371_s29, [#allocation9], %s2213_s14, %s2213_s14, %s2214_s13  }
  0x4f   : > { %2235 = sst [smem:[#allocation21_spill]] %s1976_s15  ;;  %p1450_p13 = scmp.lt.s32.totalorder %s1790_s20, 3 }
  0x50   : > { %s2236_s28 = scalar_select %p1980_p12, 1, 0 }
  0x51   : > { %s1986_s16 = sand.u32 1, %s1786_s19   ;;  %s1310_s27 = sshll.u32 %s1790_s20, 7 }
  0x52   : > { %s1245_s29 = sshll.u32 %s1986_s16, 3  ;;  %s2237_s0 = sld [smem:[#allocation22_spill]] }
  0x53   : > { %s391_s12 = scalar_lea.vmem [#allocation2], %s1245_s29  ;;  %p1997_p2 = pnand %p1450_p13, %p49_p9 }
  0x54   : > { %s398_s13 = sshll.u32 %s391_s12, 4  ;;  %s1995_s13 = int_to_ptr.vmem [resolvable:$true] %s398_s13 }
  0x55   : > { %p1660_p0 = pneg %p1997_p2 }
  0x58   : > { %s1993_s14 = scalar_lea.hbm %s2237_s0, %s1310_s27  ;;  %s1663_s22 = scalar_lea.hbm %s2237_s0, 384 }
  0x59   : > { %s1658_s7 = scalar_lea.hbm %s1993_s14, 128  ;;  %p1664_p11 = scmp.lt.s32.totalorder %s1993_s14, %s2237_s0 }
  0x5a   : > { %p1659_p10 = scmp.ne.s32.totalorder %s1993_s14, %s1658_s7  ;;  %p1665_p7 = scmp.lt.s32.totalorder %s1663_s22, %s1658_s7 }
  0x5c   : > { %p1661_p3 = pnand %p1660_p0, %p1659_p10  ;;  %p1666_p1 = por %p1665_p7, %p1664_p11 }
  0x5e   : > { %p1662_p5 = pneg %p1661_p3 }
  0x60   : > { %p1667_p9 = pnand %p1666_p1, %p1662_p5 }
  0x62   : > { %1670 = shalt.err (!%p1667_p9)
}
  0x63   : > { %s1671_s3 = scalar_lea.vmem %s1995_s13, 128  ;;  %s1800_s29 = smov [#allocation2]  }
  0x64   : > { %p1672_p13 = scmp.ne.s32.totalorder %s1995_s13, %s1671_s3  ;;  %s1676_s27 = sshll.u32 %s1800_s29, 4  ;;  %s1677_s27 = int_to_ptr.vmem [resolvable:$false] %s1676_s27 }
  0x65   : > { %s1678_s5 = scalar_lea.vmem %s1677_s27, 256  ;;  %p1679_p6 = scmp.lt.s32.totalorder %s1995_s13, %s1677_s27 }
  0x66   : > { %p1674_p10 = pnand %p1672_p13, %p1660_p0  ;;  %p1680_p12 = scmp.lt.s32.totalorder %s1678_s5, %s1671_s3 }
  0x68   : > { %p1675_p3 = pneg %p1674_p10  ;;  %p1681_p4 = por %p1680_p12, %p1679_p6 }
  0x6a   : > { %p1682_p11 = pnand %p1681_p4, %p1675_p3 }
  0x6c   : > { %1685 = shalt.err (!%p1682_p11)
}
  0x6d   : > { %s2239_s7 = smov 4   ;;  %s2240_s22 = smov 64  }
  0x6e   : > { %s2241_s30 = scalar_lea.sflag [#allocation3], %s1986_s16  ;;  %s1311_s12 = sshll.u32 %s1790_s20, 8 }
  0x6f   : > { %1438 = dma.hbm_to_vmem [thread:$0]  (!%p1997_p2), %s1993_s14, 128, %s1995_s13, %s2241_s30, %s2240_s22, %s2240_s22, %s2239_s7  }
  0x70   : > { %s2242_s29 = sshll.u32 %s1986_s16, 4  ;;  %s2038_s15 = scalar_lea.hbm %s2207_s9, %s1311_s12 }
  0x71   : > { %s412_s3 = scalar_lea.vmem [#allocation11], %s2242_s29  ;;  %s409_s19 = scalar_lea.sflag [#allocation12], %s1986_s16 }
  0x72   : > { %s419_s5 = sshll.u32 %s412_s3, 4  ;;  %s1686_s26 = scalar_lea.hbm %s2038_s15, 256  ;;  %s2040_s5 = int_to_ptr.vmem [resolvable:$true] %s419_s5 }
  0x73   : > { %p1687_p4 = scmp.ne.s32.totalorder %s2038_s15, %s1686_s26  ;;  %s1691_s7 = scalar_lea.hbm %s2207_s9, 768 }
  0x74   : > { %p1692_p5 = scmp.lt.s32.totalorder %s2038_s15, %s2207_s9  ;;  %p1693_p7 = scmp.lt.s32.totalorder %s1691_s7, %s1686_s26 }
  0x75   : > { %p1689_p6 = pnand %p1687_p4, %p1660_p0 }
  0x76   : > { %p1694_p1 = por %p1693_p7, %p1692_p5 }
  0x77   : > { %p1690_p12 = pneg %p1689_p6 }
  0x79   : > { %p1695_p9 = pnand %p1694_p1, %p1690_p12 }
  0x7b   : > { %1698 = shalt.err (!%p1695_p9)
}
  0x7c   : > { %s1699_s16 = scalar_lea.vmem %s2040_s5, 256  ;;  %s1801_s30 = smov [#allocation11]  }
  0x7d   : > { %p1700_p13 = scmp.ne.s32.totalorder %s2040_s5, %s1699_s16  ;;  %s1704_s12 = sshll.u32 %s1801_s30, 4  ;;  %s1705_s12 = int_to_ptr.vmem [resolvable:$false] %s1704_s12 }
  0x7e   : > { %s1706_s29 = scalar_lea.vmem %s1705_s12, 512  ;;  %p1707_p11 = scmp.lt.s32.totalorder %s2040_s5, %s1705_s12 }
  0x7f   : > { %p1702_p10 = pnand %p1700_p13, %p1660_p0  ;;  %p1708_p4 = scmp.lt.s32.totalorder %s1706_s29, %s1699_s16 }
  0x81   : > { %p1703_p3 = pneg %p1702_p10  ;;  %p1709_p6 = por %p1708_p4, %p1707_p11 }
  0x83   : > { %p1710_p5 = pnand %p1709_p6, %p1703_p3 }
  0x85   : > { %1713 = shalt.err (!%p1710_p5)
}
  0x86   : > { %s2243_s26 = smov 8   ;;  %s2244_s3 = smov 128  }
  0x87   : > { %1441 = dma.hbm_to_vmem [thread:$0]  (!%p1997_p2), %s2038_s15, 256, %s2040_s5, %s409_s19, %s2244_s3, %s2244_s3, %s2243_s26  }
  0x88   : > { %431 = sbr.rel (%p1908_p8) target bundleno = 1156 (0x484), region = 60  ;;  %s2071_s27 = sand.u32 (!%p1908_p8), 1, %s1782_s18  }
  0x89   : > { %s1252_s14 = sshll.u32 (!%p1908_p8), %s2071_s27, 3  ;;  %s434_s13 = scalar_lea.sflag (!%p1908_p8), [#allocation3], %s2071_s27 }
  0x8a   : > { %s2075_s7 = scalar_lea.vmem (!%p1908_p8), [#allocation2], %s1252_s14  ;;  %p2245_p0 = scmp.ne.s32.totalorder (!%p1908_p8), %s2226_s23, 0 }
  0x8d   : > { %1757 = dma.done.wait (%p2245_p0), %s434_s13, 128  }
  0x8e   : > { %1759 = vsyncadd (%p2245_p0), %s434_s13, 4294967168  ;;  %p2246_p2 = scmp.eq.s32.totalorder %s1889_s21, 0 }
  0x90   : > { %1761 = dma.done.wait (%p2246_p2), [#allocation6], 2048   ;;  %p2247_p8 = pmov %p2246_p2 }
  0x91   : > { %p2248_p12 = pmov %p2246_p2 }
  0x92   : > { %1763 = vsyncadd (%p2247_p8), [#allocation6], 4294965248 }
  0x93   : > { %1765 = dma.done.wait (%p2248_p12), [#allocation9], 3072   ;;  %p2249_p7 = pmov %p2246_p2 }
  0x94   : > { %s1257_s1 = sshll.u32 %s2071_s27, 4  ;;  %s459_s19 = scalar_lea.sflag [#allocation12], %s2071_s27 }
  0x95   : > { %1767 = vsyncadd (%p2249_p7), [#allocation9], 4294964224  ;;  %s2093_s25 = scalar_lea.vmem [#allocation11], %s1257_s1 }
  0x96   : > { %1769 = dma.done.wait (%p2245_p0), %s459_s19, 256  }
  0x97   : > { %1771 = vsyncadd (%p2245_p0), %s459_s19, 4294967040  ;;  %v1802_v0 = vmov 0.0   ;;  %vm1803_vm0 = vmmov 0   ;;  %v1501_v1 = vld [vmem:[#allocation5 + $0x38] sm:$0xff]   ;;  %v1502_v2 = vld [vmem:[#allocation5 + $0x30] sm:$0xff]   ;;  %v1804_v62 = vmov 0  }
  0x98   : > { %1340 = vmatprep.subr.bf16.mxu0 %v1802_v0  ;;  %1356 = vmatprep.mubr.msk.bf16.mxu0 %vm1803_vm0, %v1802_v0  ;;  %v1503_v3 = vld [vmem:[#allocation5 + $0x28] sm:$0xff]   ;;  %v1510_v4 = vld [vmem:[#allocation7 + $0x38] sm:$0xff]   ;;  %v1504_v5 = vld [vmem:[#allocation5 + $0x20] sm:$0xff]   ;;  %s503_s29 = scalar_lea.vmem [#allocation13], %s1257_s1  ;;  %s1312_s26 = sshll.u32 %s1889_s21, 8 }
  0x99   : > { %1360 = vmatprep.subr.bf16.mxu1 %v1802_v0  ;;  %1376 = vmatprep.mubr.msk.bf16.mxu1 %vm1803_vm0, %v1802_v0  ;;  %v1511_v6 = vld [vmem:[#allocation7 + $0x30] sm:$0xff]   ;;  %v1505_v7 = vld [vmem:[#allocation5 + $0x18] sm:$0xff]   ;;  %v1512_v8 = vld [vmem:[#allocation7 + $0x28] sm:$0xff]   ;;  %s1075_s3 = sshll.u32 %s503_s29, 4  ;;  %s1057_s19 = scalar_lea.sflag [#allocation4], %s2071_s27  ;;  %s2152_s3 = int_to_ptr.vmem [resolvable:$true] %s1075_s3 }
  0x9a   : > { %1341 = vmatpush3.bf16.msra.mxu0 %v1501_v1  ;;  %1361 = vmatpush3.bf16.msra.mxu1 %v1510_v4  ;;  %v1506_v9 = vld [vmem:[#allocation5 + $0x10] sm:$0xff]   ;;  %v1513_v10 = vld [vmem:[#allocation7 + $0x20] sm:$0xff]   ;;  %v1507_v11 = vld [vmem:[#allocation5 + $0x8] sm:$0xff]   ;;  %p2250_p9 = scmp.ne.s32.totalorder %s2236_s28, 0  ;;  %s1805_s1 = smov [#allocation13]  }
  0x9b   : > { %1342 = vmatprep.subr.bf16.mxu0 %v1802_v0  ;;  %1362 = vmatprep.subr.bf16.mxu1 %v1802_v0  ;;  %v1514_v12 = vld [vmem:[#allocation7 + $0x18] sm:$0xff]   ;;  %v1508_v13 = vld [vmem:[#allocation5] sm:$0xff]   ;;  %v1515_v15 = vld [vmem:[#allocation7 + $0x10] sm:$0xff]   ;;  %s1718_s23 = sshll.u32 %s1805_s1, 4  ;;  %s1719_s23 = int_to_ptr.vmem [resolvable:$false] %s1718_s23 }
  0x9c   : > { %v1509_v14 = vld [vmem:[%s2075_s7] sm:$0xff]   ;;  %v1516_v16 = vld [vmem:[#allocation7 + $0x8] sm:$0xff]   ;;  %v1517_v17 = vld [vmem:[#allocation7] sm:$0xff]   ;;  %s2150_s7 = scalar_lea.hbm %s2208_s10, %s1312_s26  ;;  %s1720_s15 = scalar_lea.vmem %s1719_s23, 512 }
  0x9d   : > { %v1518_v18 = vld [vmem:[#allocation8 + $0x38] sm:$0xff]   ;;  %v1519_v19 = vld [vmem:[#allocation8 + $0x30] sm:$0xff]   ;;  %v1520_v20 = vld [vmem:[#allocation8 + $0x28] sm:$0xff]   ;;  %p1721_p3 = scmp.lt.s32.totalorder %s2152_s3, %s1719_s23 }
  0x9e   : > { %1343 = vmatpush3.bf16.msra.mxu0 %v1502_v2  ;;  %1363 = vmatpush3.bf16.msra.mxu1 %v1511_v6  ;;  %v1521_v21 = vld [vmem:[#allocation8 + $0x20] sm:$0xff]   ;;  %v1522_v22 = vld [vmem:[#allocation8 + $0x18] sm:$0xff]   ;;  %v1261_v23 = vld [vmem:[%s2200_s2] ss:$0 sm:$0xff] }
  0x9f   : > { %1344 = vmatprep.subr.bf16.mxu0 %v1802_v0  ;;  %1364 = vmatprep.subr.bf16.mxu1 %v1802_v0  ;;  %v1523_v33 = vld [vmem:[#allocation8 + $0x10] sm:$0xff]   ;;  %v1524_v34 = vld [vmem:[#allocation8 + $0x8] sm:$0xff]   ;;  %v1525_v35 = vld [vmem:[#allocation8] sm:$0xff]  }
  0xa0   : > { %v1526_v36 = vld [vmem:[#allocation10 + $0x70] ss:$8 sps:$4 sm:$0xff]   ;;  %v1528_v37 = vld [vmem:[#allocation10 + $0x74] ss:$8 sps:$4 sm:$0xff]   ;;  %v1531_v38 = vld [vmem:[#allocation10 + $0x64] ss:$8 sps:$4 sm:$0xff]  }
  0xa1   : > { %v1529_v39 = vld [vmem:[#allocation10 + $0x60] ss:$8 sps:$4 sm:$0xff]   ;;  %v1534_v40 = vld [vmem:[#allocation10 + $0x54] ss:$8 sps:$4 sm:$0xff]   ;;  %v1532_v41 = vld [vmem:[#allocation10 + $0x50] ss:$8 sps:$4 sm:$0xff]  }
  0xa2   : > { %1345 = vmatpush3.bf16.msra.mxu0 %v1503_v3  ;;  %1365 = vmatpush3.bf16.msra.mxu1 %v1512_v8  ;;  %v1537_v42 = vld [vmem:[#allocation10 + $0x44] ss:$8 sps:$4 sm:$0xff]   ;;  %v1535_v43 = vld [vmem:[#allocation10 + $0x40] ss:$8 sps:$4 sm:$0xff]   ;;  %v1540_v44 = vld [vmem:[#allocation10 + $0x34] ss:$8 sps:$4 sm:$0xff]  }
  0xa3   : > { %1346 = vmatprep.subr.bf16.mxu0 %v1802_v0  ;;  %1366 = vmatprep.subr.bf16.mxu1 %v1802_v0  ;;  %v1538_v45 = vld [vmem:[#allocation10 + $0x30] ss:$8 sps:$4 sm:$0xff]   ;;  %v1543_v46 = vld [vmem:[#allocation10 + $0x24] ss:$8 sps:$4 sm:$0xff]   ;;  %v1541_v47 = vld [vmem:[#allocation10 + $0x20] ss:$8 sps:$4 sm:$0xff]  }
  0xa4   : > { %v1271_v48 = vld [vmem:[%s2202_s4] ss:$0 sm:$0xff]  ;;  %v1546_v58 = vld [vmem:[#allocation10 + $0x14] ss:$8 sps:$4 sm:$0xff]   ;;  %v1549_v60 = vld [vmem:[#allocation10 + $0x4] ss:$8 sps:$4 sm:$0xff]  }
  0xa5   : > { %v1544_v59 = vld [vmem:[#allocation10 + $0x10] ss:$8 sps:$4 sm:$0xff]   ;;  %v1547_v61 = vld [vmem:[#allocation10] ss:$8 sps:$4 sm:$0xff]  }
  0xa6   : > { %1347 = vmatpush3.bf16.msra.mxu0 %v1504_v5  ;;  %1367 = vmatpush3.bf16.msra.mxu1 %v1513_v10  ;;  %v888_v10 = vld [vmem:[%s2206_s8] sm:$0x3] }
  0xa7   : > { %1348 = vmatprep.subr.bf16.mxu0 %v1802_v0  ;;  %1368 = vmatprep.subr.bf16.mxu1 %v1802_v0 }
  0xaa   : > { %1349 = vmatpush3.bf16.msra.mxu0 %v1505_v7  ;;  %1369 = vmatpush3.bf16.msra.mxu1 %v1514_v12  ;;  %v890_v7 = vlaneseq }
  0xab   : > { %1350 = vmatprep.subr.bf16.mxu0 %v1802_v0  ;;  %1370 = vmatprep.subr.bf16.mxu1 %v1802_v0 }
  0xac   : > { %v891_v8 = vshrl.u32 %v890_v7, 7 }
  0xae   : > { %1351 = vmatpush3.bf16.msra.mxu0 %v1506_v9  ;;  %1371 = vmatpush3.bf16.msra.mxu1 %v1515_v15  ;;  %v896_v9 = vsub.s32 1, %v891_v8 }
  0xaf   : > { %1352 = vmatprep.subr.bf16.mxu0 %v1802_v0  ;;  %1372 = vmatprep.subr.bf16.mxu1 %v1802_v0 }
  0xb2   : > { %1353 = vmatpush3.bf16.msra.mxu0 %v1507_v11  ;;  %1373 = vmatpush3.bf16.msra.mxu1 %v1516_v16  ;;  %v897_v11 = vrot.slane %v888_v10, %v896_v9 }
  0xb3   : > { %1354 = vmatprep.subr.bf16.mxu0 %v1802_v0  ;;  %1374 = vmatprep.subr.bf16.mxu1 %v1802_v0 }
  0xb6   : > { %1355 = vmatpush3.bf16.msra.mxu0 %v1508_v13  ;;  %1375 = vmatpush3.bf16.msra.mxu1 %v1517_v17 }
  0xb7   : > { %1380 = vmatprep.subr.bf16.mxu0 %v1802_v0  ;;  %980 = vmatprep.subr.bf16.mxu1 %v1528_v37 }
  0xb9   : > { %1357 = vmatmul.mubr.bf16.vlgmr.msra.gmra.mxu0 %v1509_v14 }
  0xba   : > { %1396 = vmatprep.mubr.msk.bf16.mxu0 %vm1803_vm0, %v1802_v0  ;;  %1381 = vmatpush3.bf16.msra.mxu0 %v1518_v18 }
  0xbb   : > { %1382 = vmatprep.subr.bf16.mxu0 %v1802_v0 }
  0xbe   : > { %1383 = vmatpush3.bf16.msra.mxu0 %v1519_v19 }
  0xbf   : > { %1384 = vmatprep.subr.bf16.mxu0 %v1802_v0 }
  0xc2   : > { %1385 = vmatpush3.bf16.msra.mxu0 %v1520_v20  ;;  %v892_v20 = vsub.s32 0, %v891_v8 }
  0xc3   : > { %1386 = vmatprep.subr.bf16.mxu0 %v1802_v0 }
  0xc6   : > { %1387 = vmatpush3.bf16.msra.mxu0 %v1521_v21 }
  0xc7   : > { %1388 = vmatprep.subr.bf16.mxu0 %v1802_v0 }
  0xca   : > { %1389 = vmatpush3.bf16.msra.mxu0 %v1522_v22 }
  0xcb   : > { %1390 = vmatprep.subr.bf16.mxu0 %v1802_v0 }
  0xce   : > { %1391 = vmatpush3.bf16.msra.mxu0 %v1523_v33 }
  0xcf   : > { %1392 = vmatprep.subr.bf16.mxu0 %v1802_v0 }
  0xd2   : > { %1393 = vmatpush3.bf16.msra.mxu0 %v1524_v34  ;;  %v1030_v34 = vld [vmem:[%s2093_s25 + $0x8] sm:$0xff] }
  0xd3   : > { %1394 = vmatprep.subr.bf16.mxu0 %v1802_v0  ;;  %v1280_v0 = vld [vmem:[%s2204_s6] ss:$0 sm:$0xff] }
  0xd6   : > { %1395 = vmatpush3.bf16.msra.mxu0 %v1525_v35 }
 0x179   : > { %v634_v24 = vpop.f32.mrf.mxu0 }
 0x17a   : > { %v635_v26 = vadd.f32 %v1261_v23, %v634_v24 }
 0x17b   : > { %v1358_v25 = vpop.f32.mrf.mxu0 }
 0x17c   : > { %v641_v30 = vmax.f32 %v635_v26, 0.0  ;;  %v1029_v26 = vld [vmem:[%s2093_s25] sm:$0xff]  ;;  %s1714_s25 = scalar_lea.vmem %s2152_s3, 256 }
 0x17d   : > { %v637_v27 = vpop.f32.mrf.mxu0  ;;  %p1715_p1 = scmp.ne.s32.totalorder %s2152_s3, %s1714_s25  ;;  %p1722_p11 = scmp.lt.s32.totalorder %s1720_s15, %s1714_s25 }
 0x17e   : > { %v638_v28 = vadd.f32 %v1261_v23, %v637_v27  ;;  %v893_v23 = vrot.slane %v888_v10, %v892_v20 }
 0x17f   : > { %v1359_v29 = vpop.f32.mrf.mxu0  ;;  %p1716_p13 = pnand %p1715_p1, %p2250_p9  ;;  %p1723_p4 = por %p1722_p11, %p1721_p3 }
 0x180   : > { %v642_v31 = vmax.f32 %v638_v28, 0.0 }
 0x181   : > { %p1717_p10 = pneg %p1716_p13 }
 0x182   : > { %v643_v32 = vpack.c.bf16 %v642_v31, %v641_v30 }
 0x183   : > { %p1724_p6 = pnand %p1723_p4, %p1717_p10 }
 0x184   : > { %1377 = vmatmul.mubr.bf16.vlgmr.msra.gmra.mxu1 %v643_v32 }
 0x185   : > { %981 = vmatpush1.bf16.msra.mxu1 %v1526_v36  ;;  %1012 = vmatprep.mubr.bf16.mxu1 %v1804_v62 }
 0x186   : > { %982 = vmatprep.subr.bf16.mxu1 %v1531_v38 }
 0x189   : > { %983 = vmatpush1.bf16.msra.mxu1 %v1529_v39 }
 0x18a   : > { %984 = vmatprep.subr.bf16.mxu1 %v1534_v40 }
 0x18d   : > { %985 = vmatpush1.bf16.msra.mxu1 %v1532_v41 }
 0x18e   : > { %986 = vmatprep.subr.bf16.mxu1 %v1537_v42 }
 0x191   : > { %987 = vmatpush1.bf16.msra.mxu1 %v1535_v43 }
 0x192   : > { %988 = vmatprep.subr.bf16.mxu1 %v1540_v44 }
 0x195   : > { %989 = vmatpush1.bf16.msra.mxu1 %v1538_v45 }
 0x196   : > { %990 = vmatprep.subr.bf16.mxu1 %v1543_v46 }
 0x199   : > { %991 = vmatpush1.bf16.msra.mxu1 %v1541_v47 }
 0x19a   : > { %992 = vmatprep.subr.bf16.mxu1 %v1546_v58 }
 0x19d   : > { %993 = vmatpush1.bf16.msra.mxu1 %v1544_v59 }
 0x19e   : > { %994 = vmatprep.subr.bf16.mxu1 %v1549_v60 }
 0x1a1   : > { %995 = vmatpush1.bf16.msra.mxu1 %v1547_v61 }
 0x244   : > { %v749_v49 = vpop.f32.mrf.mxu1 }
 0x245   : > { %v750_v51 = vadd.f32 %v1271_v48, %v749_v49 }
 0x246   : > { %v1378_v50 = vpop.f32.mrf.mxu1 }
 0x247   : > { %v756_v55 = vmax.f32 %v750_v51, 0.0 }
 0x248   : > { %v752_v52 = vpop.f32.mrf.mxu1 }
 0x249   : > { %v753_v53 = vadd.f32 %v1271_v48, %v752_v52 }
 0x24a   : > { %v1379_v54 = vpop.f32.mrf.mxu1 }
 0x24b   : > { %v757_v56 = vmax.f32 %v753_v53, 0.0 }
 0x24d   : > { %v758_v57 = vpack.c.bf16 %v757_v56, %v756_v55 }
 0x24f   : > { %1397 = vmatmul.mubr.bf16.vlgmr.msra.gmra.mxu0 %v758_v57 }
 0x30f   : > { %v864_v63 = vpop.f32.mrf.mxu0 }
 0x310   : > { %v865_v3 = vadd.f32 %v1280_v0, %v864_v63 }
 0x311   : > { %v1398_v1 = vpop.f32.mrf.mxu0 }
 0x313   : > { %v867_v2 = vpop.f32.mrf.mxu0 }
 0x314   : > { %v868_v4 = vadd.f32 %v1280_v0, %v867_v2 }
 0x315   : > { %v1399_v5 = vpop.f32.mrf.mxu0 }
 0x316   : > { %v871_v6 = vpack.c.bf16 %v868_v4, %v865_v3 }
 0x318   : > { %1013 = vmatmul.mubr.bf16.vlgmr.msra.gmra.mxu1 %v871_v6 }
 0x3d8   : > { %v1014_v12 = vpop.f32.mrf.mxu1 }
 0x3d9   : > { %v1015_v24 = vadd.f32 %v1014_v12, %v893_v23 }
 0x3da   : > { %v1016_v13 = vpop.f32.mrf.mxu1 }
 0x3db   : > { %v1017_v14 = vadd.f32 %v1016_v13, %v897_v11  ;;  %v1039_v27 = vmul.f32 %v1015_v24, %v1015_v24 }
 0x3dc   : > { %v1018_v15 = vpop.f32.mrf.mxu1 }
 0x3dd   : > { %v1023_v16 = vmul.f32 0.5, %v1017_v14  ;;  %v1037_v25 = vadd.f32 1.0, %v1017_v14  ;;  %v1019_v28 = vadd.f32 %v1018_v15, %v893_v23 }
 0x3de   : > { %v1020_v17 = vpop.f32.mrf.mxu1 }
 0x3df   : > { %v1025_v18 = vmul.f32 1.442695, %v1023_v16  ;;  %v1021_v19 = vadd.f32 %v1020_v17, %v897_v11  ;;  %v1041_v32 = vsub.f32 %v1037_v25, %v1039_v27  ;;  %v1040_v36 = vmul.f32 %v1019_v28, %v1019_v28 }
 0x3e1   : > { %1550 = vpow2.f32 %v1025_v18  ;;  %v1024_v21 = vmul.f32 0.5, %v1021_v19  ;;  %v1038_v31 = vadd.f32 1.0, %v1021_v19 }
 0x3e3   : > { %v1027_v22 = vmul.f32 1.442695, %v1024_v21  ;;  %v1042_v40 = vsub.f32 %v1038_v31, %v1040_v36 }
 0x3e5   : > { %1552 = vpow2.f32 %v1027_v22 }
 0x3ee   : > { %v1551_v29 = vpop.eup %1550 }
 0x3ef   : > { %v1031_v30 = vmul.f32 %v1551_v29, %v1029_v26  ;;  %v1043_v33 = vmul.f32 %v1551_v29, %v1551_v29 }
 0x3f1   : > { %v1033_v35 = vadd.f32 %v1031_v30, %v1015_v24  ;;  %v1045_v37 = vsub.f32 %v1041_v32, %v1043_v33 }
 0x3f2   : > { %v1553_v38 = vpop.eup %1552 }
 0x3f3   : > { %v1032_v39 = vmul.f32 %v1553_v38, %v1030_v34  ;;  %1047 = vadd.xlane.f32.xlu0 %v1045_v37  ;;  %v1044_v41 = vmul.f32 %v1553_v38, %v1553_v38  ;;  %1035 = vst [vmem:[%s503_s29] sm:$0xff] %v1033_v35 }
 0x3f5   : > { %v1034_v42 = vadd.f32 %v1032_v39, %v1019_v28  ;;  %v1046_v43 = vsub.f32 %v1042_v40, %v1044_v41 }
 0x3f7   : > { %1049 = vadd.xlane.f32.xlu0 %v1046_v43  ;;  %1036 = vst [vmem:[%s503_s29 + $0x8] sm:$0xff] %v1034_v42 }
 0x3f8   : > { %1727 = shalt.err (!%p1724_p6)
}
 0x3f9   : > { %s1728_s5 = scalar_lea.hbm %s2150_s7, 256  ;;  %s1732_s16 = scalar_lea.hbm %s2208_s10, 768 }
 0x3fa   : > { %p1729_p5 = scmp.ne.s32.totalorder %s2150_s7, %s1728_s5  ;;  %p1733_p8 = scmp.lt.s32.totalorder %s2150_s7, %s2208_s10 }
 0x3fb   : > { %p1734_p12 = scmp.lt.s32.totalorder %s1732_s16, %s1728_s5 }
 0x3fc   : > { %p1730_p0 = pnand %p1729_p5, %p2250_p9 }
 0x3fd   : > { %p1735_p7 = por %p1734_p12, %p1733_p8 }
 0x3fe   : > { %p1731_p2 = pneg %p1730_p0 }
 0x400   : > { %p1736_p1 = pnand %p1735_p7, %p1731_p2 }
 0x402   : > { %1739 = shalt.err (!%p1736_p1)
}
 0x403   : > { %s1806_s29 = smov 128   ;;  %s1807_s26 = smov 8   ;;  %vm1053_vm1 = vcmask 7168  }
 0x404   : > { %1420 = dma.vmem_to_hbm [thread:$0]  (%p2250_p9), %s2152_s3, 256, %s2150_s7, %s1057_s19, %s1806_s29, %s1806_s29, %s1807_s26  }
 0x405   : > { %s1259_s14 = sshll.u32 %s1889_s21, 1 }
 0x406   : > { %p515_p13 = scmp.lt.s32.totalorder %s1259_s14, 5 }
 0x408   : > { %s2258_s14 = smov (!%p515_p13, %s1259_s14), 5 }
 0x409   : > { %s1260_s13 = sshll.u32 %s2258_s14, 3 }
 0x40a   : > { %s518_s23 = scalar_lea.vmem %s2209_s11, %s1260_s13 }
 0x47c   : > { %v1048_v44 = vpop.xlane.xlu0 %1047 }
 0x47d   : > { %v1051_v45 = vmul.f32 -0.5, %v1048_v44 }
 0x47f   : > { %1054 = vst.msk [vmem:[%s518_s23] sm:$0xff] %vm1053_vm1, %v1051_v45 }
 0x480   : > { %v1050_v46 = vpop.xlane.xlu0 %1049 }
 0x481   : > { %v1052_v47 = vmul.f32 -0.5, %v1050_v46 }
 0x483   : > { %1055 = vst.msk [vmem:[%s518_s23 + $0x8] sm:$0xff] %vm1053_vm1, %v1052_v47 }
 0x484 PF: > { %p1455_p9 = scmp.ge.s32.totalorder %s1790_s20, 2  ;;  %s1094_s21 = sand.u32 1, %s1778_s17  }
 0x485   : > { %p2251_p10 = scmp.ne.s32.totalorder %s2227_s24, 0  ;;  %s1095_s28 = scalar_lea.sflag [#allocation4], %s1094_s21 }
 0x487   : > { %p1443_p3 = pnand %p1455_p9, %p2251_p10 }
 0x489   : > { %p1444_p11 = pneg %p1443_p3 }
 0x48b   : > { %1773 = dma.done.wait (%p1444_p11), %s1095_s28, 256  }
 0x48c   : > { %1775 = vsyncadd (%p1444_p11), %s1095_s28, 4294967040  ;;  %s2252_s20 = sld [smem:[#allocation20_spill]]  ;;  %s2255_s17 = smov %s1782_s18 }
 0x48d   : > { %s2253_s27 = sld [smem:[#allocation19_spill]] }
 0x48e   : > { %s2254_s19 = sld [smem:[#allocation21_spill]] }
 0x492   : > { %p30_p4 = scmp.ge.s32.totalorder %s2252_s20, 5  }
 0x493   : > { %s2256_s18 = smov %s2253_s27 }
 0x494   :  { %32 = sbr.rel (!%p30_p4) target bundleno = 15 (0xf), region = 146 }
 0x499   :  { %1108 = vsyncpa [#allocation3], 1 }
 0x49a   :  { %1110 = vsyncpa [#allocation3 + $0x1], 1 }
 0x49b   :  { %1111 = vsyncpa [#allocation6], 1 }
 0x49c   :  { %1112 = vsyncpa [#allocation9], 1 }
 0x49d   :  { %1113 = vsyncpa [#allocation12], 1 }
 0x49e   :  { %1115 = vsyncpa [#allocation12 + $0x1], 1 }
 0x49f   :  { %1116 = vsyncpa [#allocation4], 1 }
 0x4a0   :  { %1118 = vsyncpa [#allocation4 + $0x1], 1 }

</bundles_post_ra>
